<compile_context>
chip_gen: v6e
topology: v6e:2x2x1
jax: 0.10.0
libtpu: 0.0.40
codegen_flags: <defaults>
</compile_context>

<pallas_src>
import math
import functools

import jax
import jax.numpy as jnp
from jax import lax
from jax.experimental import pallas as pl
from jax.experimental.pallas import tpu as pltpu


def _eff(w):
    """Binarized effective weight: sign(W) * mean(|W|) (scalar L1 mean)."""
    return jnp.sign(w) * jnp.mean(jnp.abs(w))


def _round_up(x, m):
    return ((x + m - 1) // m) * m


def _pad2(a, rows, cols):
    return jnp.pad(a, ((0, rows - a.shape[0]), (0, cols - a.shape[1])))


# ----------------------------------------------------------------------------
# Pallas kernel: one grid step == TT LSTM time steps (serial recurrence).
# Fused gate order along the 4H axis: [i, f, o, g].
# ----------------------------------------------------------------------------
def _binary_lstm_kernel(
    x_ref,      # (TT*BP, I)   time-major input rows (t outer, b inner)
    h0_ref,     # (BP, HP)     initial hidden state
    c0_ref,     # (BP, HP)     initial cell state
    wx_ref,     # (I, 4*HP)    binarized x->gates weights
    wh_ref,     # (HP, 4*HP)   binarized h->gates weights
    b_ref,      # (1, 4*HP)    fused (input + hidden) binarized biases
    hseq_ref,   # (TT*BP, HP)  output hidden states (time-major rows)
    hout_ref,   # (BP, HP)     final hidden state
    cout_ref,   # (BP, HP)     final cell state
    h_sc,       # VMEM (BP, HP)       carried hidden state
    c_sc,       # VMEM (BP, HP)       carried cell state
    xp_sc,      # VMEM (TT*BP, 4*HP)  x-projection for this time block
    *, tt, bp, hp, seq_len, mask_tail, unroll,
):
    tb = pl.program_id(0)

    @pl.when(tb == 0)
    def _():
        h_sc[...] = h0_ref[...]
        c_sc[...] = c0_ref[...]

    # ---- fused non-recurrent x-projection for this block: one MXU matmul,
    # result stays in VMEM (no HBM round trip of the (B, T, 4H) activations).
    xp_sc[...] = (
        jnp.dot(x_ref[...], wx_ref[...], preferred_element_type=jnp.float32)
        + b_ref[...]
    )

    wh = wh_ref[...]          # hoisted: loaded once per grid step
    t_base = tb * tt

    def step(t, carry):
        h, c = carry
        row = pl.multiple_of(t * bp, bp)          # sublane-aligned window start
        # Only the serial h-path matmul runs inside the time loop.
        pre = xp_sc[pl.ds(row, bp), :] + jnp.dot(
            h, wh, preferred_element_type=jnp.float32)
        # sigmoid(x) = 0.5*tanh(0.5*x) + 0.5 : single EUP op per element;
        # slices are lane-aligned because hp % 128 == 0.
        ifo = 0.5 * jnp.tanh(0.5 * pre[:, : 3 * hp]) + 0.5
        g = jnp.tanh(pre[:, 3 * hp:])
        i = ifo[:, :hp]
        f = ifo[:, hp: 2 * hp]
        o = ifo[:, 2 * hp:]
        c_next = f * c + i * g
        h_next = o * jnp.tanh(c_next)
        hseq_ref[pl.ds(row, bp), :] = h_next
        if mask_tail:
            # Freeze the carried state on padded time steps so the final
            # (h, c) correspond to the true sequence length.
            valid = (t_base + t) < seq_len
            h_next = jnp.where(valid, h_next, h)
            c_next = jnp.where(valid, c_next, c)
        return h_next, c_next

    h, c = lax.fori_loop(0, tt, step, (h_sc[...], c_sc[...]), unroll=unroll)
    h_sc[...] = h
    c_sc[...] = c

    # Final-state outputs are VMEM-resident accumulators; write only once.
    @pl.when(tb == pl.num_programs(0) - 1)
    def _():
        hout_ref[...] = h
        cout_ref[...] = c


# ----------------------------------------------------------------------------
# Generation-aware tiling helpers.
# ----------------------------------------------------------------------------
def _vmem_capacity_bytes():
    try:
        info = pltpu.get_tpu_info()
        cap = getattr(info, "vmem_capacity_bytes", None)
        if cap:
            return int(cap)
    except Exception:
        pass
    return 64 << 20  # conservative fallback == v7x per-TensorCore VMEM


def _pick_time_block(T, BP, I, HP, vmem_budget, cap=128):
    """Largest time-block (multiple of 8, <= cap) fitting the VMEM budget."""
    GH = 4 * HP
    fixed = 4 * (2 * (I * GH + HP * GH + GH) + 10 * BP * HP)      # weights (x2 buf) + states
    per_tt = 4 * (2 * BP * I + 2 * BP * HP + BP * GH)             # x/hseq blocks (x2) + xp scratch
    avail = max(vmem_budget - fixed, 8 * per_tt)
    tt = max(8, min((avail // per_tt) // 8 * 8, cap))
    tt = min(tt, _round_up(T, 8))
    return int(tt), int(fixed + tt * per_tt)


# ----------------------------------------------------------------------------
def binary_lstm_forward(inputs, state, params):
    """inputs: (B, T, I) batch-first.  state: (h0, c0) each (1, B, H) or None.

    Returns (hidden_seq (B, T, H), (h (1, B, H), c (1, B, H))) like PyTorch.
    """
    B, T, I = inputs.shape
    H = params["w_ii"].shape[0]
    BP = _round_up(B, 8)       # batch -> f32 sublane tile
    HP = _round_up(H, 128)     # per-gate width -> lane tile
    GH = 4 * HP

    if state is None:
        h0 = jnp.zeros((B, H), jnp.float32)
        c0 = jnp.zeros((B, H), jnp.float32)
    else:
        h0 = state[0].reshape(B, H).astype(jnp.float32)
        c0 = state[1].reshape(B, H).astype(jnp.float32)
    h0 = _pad2(h0, BP, HP)
    c0 = _pad2(c0, BP, HP)

    # ---- binarize + fuse weights in the wrapper (gate order [i, f, o, g]).
    # Zero padding is inert: padded gate columns get pre=0 -> g=0, c stays 0,
    # h stays 0, and padded Wh rows are zero so real gates are untouched.
    wx = jnp.concatenate(
        [_pad2(_eff(params[k]).T, I, HP) for k in ("w_ii", "w_if", "w_io", "w_ig")],
        axis=1)                                                            # (I, 4HP)
    wh = jnp.concatenate(
        [_pad2(_eff(params[k]).T, HP, HP) for k in ("w_hi", "w_hf", "w_ho", "w_hg")],
        axis=1)                                                            # (HP, 4HP)
    bias = jnp.concatenate(
        [_pad2((_eff(params[bi]) + _eff(params[bh])).T, 1, HP)
         for bi, bh in (("b_ii", "b_hi"), ("b_if", "b_hf"),
                        ("b_io", "b_ho"), ("b_ig", "b_hg"))], axis=1)      # (1, 4HP)

    # ---- generation-aware time-block / VMEM budget ----
    vmem_budget = int(_vmem_capacity_bytes() * 0.75)   # headroom (v7x: 64 MiB/TC)
    TT, est_bytes = _pick_time_block(T, BP, I, HP, vmem_budget)
    TP = _round_up(T, TT)
    NT = TP // TT
    vmem_limit = int(min(max(est_bytes + (4 << 20), 16 << 20), vmem_budget))
    unroll = True if TT <= 16 else 8

    # ---- time-major, zero-padded input, flattened to sublane-dense 2D rows ----
    xpad = jnp.zeros((BP, TP, I), jnp.float32).at[:B, :T, :].set(
        inputs.astype(jnp.float32))
    x2d = jnp.transpose(xpad, (1, 0, 2)).reshape(TP * BP, I)

    kernel = functools.partial(
        _binary_lstm_kernel, tt=TT, bp=BP, hp=HP, seq_len=T,
        mask_tail=(TP != T), unroll=unroll)

    hseq2d, h_fin, c_fin = pl.pallas_call(
        kernel,
        out_shape=(
            jax.ShapeDtypeStruct((TP * BP, HP), jnp.float32),
            jax.ShapeDtypeStruct((BP, HP), jnp.float32),
            jax.ShapeDtypeStruct((BP, HP), jnp.float32),
        ),
        grid_spec=pltpu.PrefetchScalarGridSpec(
            num_scalar_prefetch=0,
            grid=(NT,),
            in_specs=[
                pl.BlockSpec((TT * BP, I), lambda t: (t, 0)),     # x rows (time-major)
                pl.BlockSpec((BP, HP), lambda t: (0, 0)),         # h0
                pl.BlockSpec((BP, HP), lambda t: (0, 0)),         # c0
                pl.BlockSpec((I, GH), lambda t: (0, 0)),          # Wx_eff
                pl.BlockSpec((HP, GH), lambda t: (0, 0)),         # Wh_eff
                pl.BlockSpec((1, GH), lambda t: (0, 0)),          # fused bias
            ],
            out_specs=[
                pl.BlockSpec((TT * BP, HP), lambda t: (t, 0)),    # hidden_seq rows
                pl.BlockSpec((BP, HP), lambda t: (0, 0)),         # final h
                pl.BlockSpec((BP, HP), lambda t: (0, 0)),         # final c
            ],
            scratch_shapes=[
                pltpu.VMEM((BP, HP), jnp.float32),                # h carry
                pltpu.VMEM((BP, HP), jnp.float32),                # c carry
                pltpu.VMEM((TT * BP, GH), jnp.float32),           # x-projection block
            ],
        ),
        compiler_params=pltpu.CompilerParams(
            dimension_semantics=("arbitrary",),
            vmem_limit_bytes=vmem_limit,
        ),
    )(x2d, h0, c0, wx, wh, bias)

    hseq = hseq2d.reshape(TP, BP, HP).transpose(1, 0, 2)[:B, :T, :H]
    h_out = h_fin[:B, :H].reshape(1, B, H)
    c_out = c_fin[:B, :H].reshape(1, B, H)
    return hseq, (h_out, c_out)


# ----------------------------------------------------------------------------
# Pure-JAX reference (mirrors the PyTorch forward) for a correctness check.
# ----------------------------------------------------------------------------
def binary_lstm_reference(inputs, state, params):
    B, T, I = inputs.shape
    H = params["w_ii"].shape[0]
    h, c = state[0].reshape(B, H), state[1].reshape(B, H)
    outs = []
    for t in range(T):
        x = inputs[:, t, :]

        def pre(wi, bi, wh, bh):
            return (x @ _eff(params[wi]).T + _eff(params[bi]).T
                    + h @ _eff(params[wh]).T + _eff(params[bh]).T)

        i = jax.nn.sigmoid(pre("w_ii", "b_ii", "w_hi", "b_hi"))
        f = jax.nn.sigmoid(pre("w_if", "b_if", "w_hf", "b_hf"))
        g = jnp.tanh(pre("w_ig", "b_ig", "w_hg", "b_hg"))
        o = jax.nn.sigmoid(pre("w_io", "b_io", "w_ho", "b_ho"))
        c = f * c + i * g
        h = o * jnp.tanh(c)
        outs.append(h)
    hidden_seq = jnp.stack(outs, axis=1)                      # (B, T, H)
    return hidden_seq, (h.reshape(1, B, H), c.reshape(1, B, H))


# ----------------------------------------------------------------------------
def init_params(key, input_size, hidden_size):
    stdv = 1.0 / math.sqrt(hidden_size)
    names_shapes = []
    for g in ("i", "f", "o", "g"):
        names_shapes += [
            (f"w_i{g}", (hidden_size, input_size)),
            (f"w_h{g}", (hidden_size, hidden_size)),
            (f"b_i{g}", (hidden_size, 1)),
            (f"b_h{g}", (hidden_size, 1)),
        ]
    keys = jax.random.split(key, len(names_shapes))
    return {
        name: jax.random.uniform(k, shape, jnp.float32, -stdv, stdv)
        for (name, shape), k in zip(names_shapes, keys)
    }


if __name__ == "__main__":
    B, T, I, H = 2, 8, 16, 32

    key = jax.random.PRNGKey(0)
    k_in, k_h, k_c, k_p = jax.random.split(key, 4)

    inputs = jax.random.normal(k_in, (B, T, I), jnp.float32)
    h0 = jax.random.normal(k_h, (1, B, H), jnp.float32)
    c0 = jax.random.normal(k_c, (1, B, H), jnp.float32)
    params = init_params(k_p, I, H)

    hseq, (h_fin, c_fin) = jax.block_until_ready(
        binary_lstm_forward(inputs, (h0, c0), params))

    hseq_ref, (h_ref, c_ref) = binary_lstm_reference(inputs, (h0, c0), params)

    assert hseq.shape == (B, T, H)
    assert h_fin.shape == (1, B, H) and c_fin.shape == (1, B, H)
    assert jnp.allclose(hseq, hseq_ref, atol=1e-5, rtol=1e-5)
    assert jnp.allclose(h_fin, h_ref, atol=1e-5, rtol=1e-5)
    assert jnp.allclose(c_fin, c_ref, atol=1e-5, rtol=1e-5)

    print("KERNEL_OK")
</pallas_src>

<mosaic_0001>
module attributes {stable_mosaic.version = 11 : i64} {
  func.func @_binary_lstm_kernel(%arg0: i32, %arg1: memref<64x16xf32, #tpu.memory_space<vmem>>, %arg2: memref<8x128xf32, #tpu.memory_space<vmem>>, %arg3: memref<8x128xf32, #tpu.memory_space<vmem>>, %arg4: memref<16x512xf32, #tpu.memory_space<vmem>>, %arg5: memref<128x512xf32, #tpu.memory_space<vmem>>, %arg6: memref<1x512xf32, #tpu.memory_space<vmem>>, %arg7: memref<64x128xf32, #tpu.memory_space<vmem>>, %arg8: memref<8x128xf32, #tpu.memory_space<vmem>>, %arg9: memref<8x128xf32, #tpu.memory_space<vmem>>, %arg10: memref<8x128xf32, #tpu.memory_space<vmem>>, %arg11: memref<8x128xf32, #tpu.memory_space<vmem>>, %arg12: memref<64x512xf32, #tpu.memory_space<vmem>>) attributes {dimension_semantics = [#tpu.dimension_semantics<arbitrary>], iteration_bounds = array<i64: 1>, scalar_prefetch = 0 : i64, scratch_operands = 3 : i64, tpu.core_type = #tpu.core_type<tc>, window_params = [{transform_indices = @transform_0, window_bounds = array<i64: 64, 16>}, {pipeline_mode = #tpu.pipeline_mode<synchronous>, transform_indices = @transform_1, window_bounds = array<i64: 8, 128>}, {pipeline_mode = #tpu.pipeline_mode<synchronous>, transform_indices = @transform_2, window_bounds = array<i64: 8, 128>}, {pipeline_mode = #tpu.pipeline_mode<synchronous>, transform_indices = @transform_3, window_bounds = array<i64: 16, 512>}, {pipeline_mode = #tpu.pipeline_mode<synchronous>, transform_indices = @transform_4, window_bounds = array<i64: 128, 512>}, {pipeline_mode = #tpu.pipeline_mode<synchronous>, transform_indices = @transform_5, window_bounds = array<i64: 1, 512>}, {transform_indices = @transform_6, window_bounds = array<i64: 64, 128>}, {pipeline_mode = #tpu.pipeline_mode<synchronous>, transform_indices = @transform_7, window_bounds = array<i64: 8, 128>}, {pipeline_mode = #tpu.pipeline_mode<synchronous>, transform_indices = @transform_8, window_bounds = array<i64: 8, 128>}]} {
    %c0_i32 = arith.constant 0 : i32
    %0 = arith.cmpi eq, %arg0, %c0_i32 : i32
    %1 = arith.extui %0 : i1 to i32
    %c0_i32_0 = arith.constant 0 : i32
    %2 = arith.cmpi ne, %1, %c0_i32_0 : i32
    scf.if %2 {
      %c0_77 = arith.constant 0 : index
      %c0_78 = arith.constant 0 : index
      %226 = vector.load %arg2[%c0_77, %c0_78] : memref<8x128xf32, #tpu.memory_space<vmem>>, vector<8x128xf32>
      %c0_79 = arith.constant 0 : index
      %c0_80 = arith.constant 0 : index
      %227 = vector.load %arg10[%c0_79, %c0_80] : memref<8x128xf32, #tpu.memory_space<vmem>>, vector<8x128xf32>
      tpu.vector_store %arg10[%c0_79, %c0_80], %226 {strides = array<i32>} : memref<8x128xf32, #tpu.memory_space<vmem>>, vector<8x128xf32>,
      %c0_81 = arith.constant 0 : index
      %c0_82 = arith.constant 0 : index
      %228 = vector.load %arg3[%c0_81, %c0_82] : memref<8x128xf32, #tpu.memory_space<vmem>>, vector<8x128xf32>
      %c0_83 = arith.constant 0 : index
      %c0_84 = arith.constant 0 : index
      %229 = vector.load %arg11[%c0_83, %c0_84] : memref<8x128xf32, #tpu.memory_space<vmem>>, vector<8x128xf32>
      tpu.vector_store %arg11[%c0_83, %c0_84], %228 {strides = array<i32>} : memref<8x128xf32, #tpu.memory_space<vmem>>, vector<8x128xf32>,
    } else {
    }
    %c0 = arith.constant 0 : index
    %c0_1 = arith.constant 0 : index
    %3 = vector.load %arg1[%c0, %c0_1] : memref<64x16xf32, #tpu.memory_space<vmem>>, vector<64x16xf32>
    %c0_2 = arith.constant 0 : index
    %c0_3 = arith.constant 0 : index
    %4 = vector.load %arg4[%c0_2, %c0_3] : memref<16x512xf32, #tpu.memory_space<vmem>>, vector<16x512xf32>
    %cst = arith.constant dense<0.000000e+00> : vector<64x512xf32>
    %5 = tpu.matmul %3, %4, %cst {dimension_numbers = #tpu.dot_dimension_numbers<[1], [0], [0], [1], [0, 0, 1, 1], [], []>} : vector<64x16xf32>, vector<16x512xf32>, vector<64x512xf32> -> vector<64x512xf32>
    %c0_4 = arith.constant 0 : index
    %c0_5 = arith.constant 0 : index
    %6 = vector.load %arg6[%c0_4, %c0_5] : memref<1x512xf32, #tpu.memory_space<vmem>>, vector<1x512xf32>
    %7 = vector.broadcast %6 : vector<1x512xf32> to vector<64x512xf32>
    %8 = arith.addf %5, %7 : vector<64x512xf32>
    %c0_6 = arith.constant 0 : index
    %c0_7 = arith.constant 0 : index
    %9 = vector.load %arg12[%c0_6, %c0_7] : memref<64x512xf32, #tpu.memory_space<vmem>>, vector<64x512xf32>
    tpu.vector_store %arg12[%c0_6, %c0_7], %8 {strides = array<i32>} : memref<64x512xf32, #tpu.memory_space<vmem>>, vector<64x512xf32>,
    %c0_8 = arith.constant 0 : index
    %c0_9 = arith.constant 0 : index
    %10 = vector.load %arg5[%c0_8, %c0_9] : memref<128x512xf32, #tpu.memory_space<vmem>>, vector<128x512xf32>
    %c0_10 = arith.constant 0 : index
    %c0_11 = arith.constant 0 : index
    %11 = vector.load %arg10[%c0_10, %c0_11] : memref<8x128xf32, #tpu.memory_space<vmem>>, vector<8x128xf32>
    %c0_12 = arith.constant 0 : index
    %c0_13 = arith.constant 0 : index
    %12 = vector.load %arg11[%c0_12, %c0_13] : memref<8x128xf32, #tpu.memory_space<vmem>>, vector<8x128xf32>
    %c0_i32_14 = arith.constant 0 : i32
    %c8_i32 = arith.constant 8 : i32
    %13 = arith.muli %c0_i32_14, %c8_i32 : i32
    %14 = tpu.assume_multiple %13, 8 : i32
    %15 = arith.index_cast %14 : i32 to index
    %c0_15 = arith.constant 0 : index
    %16 = vector.load %arg12[%15, %c0_15] : memref<64x512xf32, #tpu.memory_space<vmem>>, vector<8x512xf32>
    %cst_16 = arith.constant dense<0.000000e+00> : vector<8x512xf32>
    %17 = tpu.matmul %11, %10, %cst_16 {dimension_numbers = #tpu.dot_dimension_numbers<[1], [0], [0], [1], [0, 0, 1, 1], [], []>} : vector<8x128xf32>, vector<128x512xf32>, vector<8x512xf32> -> vector<8x512xf32>
    %18 = arith.addf %16, %17 : vector<8x512xf32>
    %19 = vector.extract_strided_slice %18 {offsets = [0, 0], sizes = [8, 384], strides = [1, 1]} : vector<8x512xf32> to vector<8x384xf32>
    %cst_17 = arith.constant 5.000000e-01 : f32
    %20 = vector.broadcast %cst_17 : f32 to vector<8x384xf32>
    %21 = arith.mulf %20, %19 : vector<8x384xf32>
    %22 = math.tanh %21 : vector<8x384xf32>
    %cst_18 = arith.constant 5.000000e-01 : f32
    %23 = vector.broadcast %cst_18 : f32 to vector<8x384xf32>
    %24 = arith.mulf %23, %22 : vector<8x384xf32>
    %cst_19 = arith.constant 5.000000e-01 : f32
    %25 = vector.broadcast %cst_19 : f32 to vector<8x384xf32>
    %26 = arith.addf %24, %25 : vector<8x384xf32>
    %27 = vector.extract_strided_slice %18 {offsets = [0, 384], sizes = [8, 128], strides = [1, 1]} : vector<8x512xf32> to vector<8x128xf32>
    %28 = math.tanh %27 : vector<8x128xf32>
    %29 = vector.extract_strided_slice %26 {offsets = [0, 0], sizes = [8, 128], strides = [1, 1]} : vector<8x384xf32> to vector<8x128xf32>
    %30 = vector.extract_strided_slice %26 {offsets = [0, 128], sizes = [8, 128], strides = [1, 1]} : vector<8x384xf32> to vector<8x128xf32>
    %31 = vector.extract_strided_slice %26 {offsets = [0, 256], sizes = [8, 128], strides = [1, 1]} : vector<8x384xf32> to vector<8x128xf32>
    %32 = arith.mulf %30, %12 : vector<8x128xf32>
    %33 = arith.mulf %29, %28 : vector<8x128xf32>
    %34 = arith.addf %32, %33 : vector<8x128xf32>
    %35 = math.tanh %34 : vector<8x128xf32>
    %36 = arith.mulf %31, %35 : vector<8x128xf32>
    %37 = arith.index_cast %14 : i32 to index
    %c0_20 = arith.constant 0 : index
    %38 = vector.load %arg7[%37, %c0_20] : memref<64x128xf32, #tpu.memory_space<vmem>>, vector<8x128xf32>
    tpu.vector_store %arg7[%37, %c0_20], %36 {strides = array<i32>} : memref<64x128xf32, #tpu.memory_space<vmem>>, vector<8x128xf32>,
    %c1_i32 = arith.constant 1 : i32
    %c8_i32_21 = arith.constant 8 : i32
    %39 = arith.muli %c1_i32, %c8_i32_21 : i32
    %40 = tpu.assume_multiple %39, 8 : i32
    %41 = arith.index_cast %40 : i32 to index
    %c0_22 = arith.constant 0 : index
    %42 = vector.load %arg12[%41, %c0_22] : memref<64x512xf32, #tpu.memory_space<vmem>>, vector<8x512xf32>
    %cst_23 = arith.constant dense<0.000000e+00> : vector<8x512xf32>
    %43 = tpu.matmul %36, %10, %cst_23 {dimension_numbers = #tpu.dot_dimension_numbers<[1], [0], [0], [1], [0, 0, 1, 1], [], []>} : vector<8x128xf32>, vector<128x512xf32>, vector<8x512xf32> -> vector<8x512xf32>
    %44 = arith.addf %42, %43 : vector<8x512xf32>
    %45 = vector.extract_strided_slice %44 {offsets = [0, 0], sizes = [8, 384], strides = [1, 1]} : vector<8x512xf32> to vector<8x384xf32>
    %cst_24 = arith.constant 5.000000e-01 : f32
    %46 = vector.broadcast %cst_24 : f32 to vector<8x384xf32>
    %47 = arith.mulf %46, %45 : vector<8x384xf32>
    %48 = math.tanh %47 : vector<8x384xf32>
    %cst_25 = arith.constant 5.000000e-01 : f32
    %49 = vector.broadcast %cst_25 : f32 to vector<8x384xf32>
    %50 = arith.mulf %49, %48 : vector<8x384xf32>
    %cst_26 = arith.constant 5.000000e-01 : f32
    %51 = vector.broadcast %cst_26 : f32 to vector<8x384xf32>
    %52 = arith.addf %50, %51 : vector<8x384xf32>
    %53 = vector.extract_strided_slice %44 {offsets = [0, 384], sizes = [8, 128], strides = [1, 1]} : vector<8x512xf32> to vector<8x128xf32>
    %54 = math.tanh %53 : vector<8x128xf32>
    %55 = vector.extract_strided_slice %52 {offsets = [0, 0], sizes = [8, 128], strides = [1, 1]} : vector<8x384xf32> to vector<8x128xf32>
    %56 = vector.extract_strided_slice %52 {offsets = [0, 128], sizes = [8, 128], strides = [1, 1]} : vector<8x384xf32> to vector<8x128xf32>
    %57 = vector.extract_strided_slice %52 {offsets = [0, 256], sizes = [8, 128], strides = [1, 1]} : vector<8x384xf32> to vector<8x128xf32>
    %58 = arith.mulf %56, %34 : vector<8x128xf32>
    %59 = arith.mulf %55, %54 : vector<8x128xf32>
    %60 = arith.addf %58, %59 : vector<8x128xf32>
    %61 = math.tanh %60 : vector<8x128xf32>
    %62 = arith.mulf %57, %61 : vector<8x128xf32>
    %63 = arith.index_cast %40 : i32 to index
    %c0_27 = arith.constant 0 : index
    %64 = vector.load %arg7[%63, %c0_27] : memref<64x128xf32, #tpu.memory_space<vmem>>, vector<8x128xf32>
    tpu.vector_store %arg7[%63, %c0_27], %62 {strides = array<i32>} : memref<64x128xf32, #tpu.memory_space<vmem>>, vector<8x128xf32>,
    %c2_i32 = arith.constant 2 : i32
    %c8_i32_28 = arith.constant 8 : i32
    %65 = arith.muli %c2_i32, %c8_i32_28 : i32
    %66 = tpu.assume_multiple %65, 8 : i32
    %67 = arith.index_cast %66 : i32 to index
    %c0_29 = arith.constant 0 : index
    %68 = vector.load %arg12[%67, %c0_29] : memref<64x512xf32, #tpu.memory_space<vmem>>, vector<8x512xf32>
    %cst_30 = arith.constant dense<0.000000e+00> : vector<8x512xf32>
    %69 = tpu.matmul %62, %10, %cst_30 {dimension_numbers = #tpu.dot_dimension_numbers<[1], [0], [0], [1], [0, 0, 1, 1], [], []>} : vector<8x128xf32>, vector<128x512xf32>, vector<8x512xf32> -> vector<8x512xf32>
    %70 = arith.addf %68, %69 : vector<8x512xf32>
    %71 = vector.extract_strided_slice %70 {offsets = [0, 0], sizes = [8, 384], strides = [1, 1]} : vector<8x512xf32> to vector<8x384xf32>
    %cst_31 = arith.constant 5.000000e-01 : f32
    %72 = vector.broadcast %cst_31 : f32 to vector<8x384xf32>
    %73 = arith.mulf %72, %71 : vector<8x384xf32>
    %74 = math.tanh %73 : vector<8x384xf32>
    %cst_32 = arith.constant 5.000000e-01 : f32
    %75 = vector.broadcast %cst_32 : f32 to vector<8x384xf32>
    %76 = arith.mulf %75, %74 : vector<8x384xf32>
    %cst_33 = arith.constant 5.000000e-01 : f32
    %77 = vector.broadcast %cst_33 : f32 to vector<8x384xf32>
    %78 = arith.addf %76, %77 : vector<8x384xf32>
    %79 = vector.extract_strided_slice %70 {offsets = [0, 384], sizes = [8, 128], strides = [1, 1]} : vector<8x512xf32> to vector<8x128xf32>
    %80 = math.tanh %79 : vector<8x128xf32>
    %81 = vector.extract_strided_slice %78 {offsets = [0, 0], sizes = [8, 128], strides = [1, 1]} : vector<8x384xf32> to vector<8x128xf32>
    %82 = vector.extract_strided_slice %78 {offsets = [0, 128], sizes = [8, 128], strides = [1, 1]} : vector<8x384xf32> to vector<8x128xf32>
    %83 = vector.extract_strided_slice %78 {offsets = [0, 256], sizes = [8, 128], strides = [1, 1]} : vector<8x384xf32> to vector<8x128xf32>
    %84 = arith.mulf %82, %60 : vector<8x128xf32>
    %85 = arith.mulf %81, %80 : vector<8x128xf32>
    %86 = arith.addf %84, %85 : vector<8x128xf32>
    %87 = math.tanh %86 : vector<8x128xf32>
    %88 = arith.mulf %83, %87 : vector<8x128xf32>
    %89 = arith.index_cast %66 : i32 to index
    %c0_34 = arith.constant 0 : index
    %90 = vector.load %arg7[%89, %c0_34] : memref<64x128xf32, #tpu.memory_space<vmem>>, vector<8x128xf32>
    tpu.vector_store %arg7[%89, %c0_34], %88 {strides = array<i32>} : memref<64x128xf32, #tpu.memory_space<vmem>>, vector<8x128xf32>,
    %c3_i32 = arith.constant 3 : i32
    %c8_i32_35 = arith.constant 8 : i32
    %91 = arith.muli %c3_i32, %c8_i32_35 : i32
    %92 = tpu.assume_multiple %91, 8 : i32
    %93 = arith.index_cast %92 : i32 to index
    %c0_36 = arith.constant 0 : index
    %94 = vector.load %arg12[%93, %c0_36] : memref<64x512xf32, #tpu.memory_space<vmem>>, vector<8x512xf32>
    %cst_37 = arith.constant dense<0.000000e+00> : vector<8x512xf32>
    %95 = tpu.matmul %88, %10, %cst_37 {dimension_numbers = #tpu.dot_dimension_numbers<[1], [0], [0], [1], [0, 0, 1, 1], [], []>} : vector<8x128xf32>, vector<128x512xf32>, vector<8x512xf32> -> vector<8x512xf32>
    %96 = arith.addf %94, %95 : vector<8x512xf32>
    %97 = vector.extract_strided_slice %96 {offsets = [0, 0], sizes = [8, 384], strides = [1, 1]} : vector<8x512xf32> to vector<8x384xf32>
    %cst_38 = arith.constant 5.000000e-01 : f32
    %98 = vector.broadcast %cst_38 : f32 to vector<8x384xf32>
    %99 = arith.mulf %98, %97 : vector<8x384xf32>
    %100 = math.tanh %99 : vector<8x384xf32>
    %cst_39 = arith.constant 5.000000e-01 : f32
    %101 = vector.broadcast %cst_39 : f32 to vector<8x384xf32>
    %102 = arith.mulf %101, %100 : vector<8x384xf32>
    %cst_40 = arith.constant 5.000000e-01 : f32
    %103 = vector.broadcast %cst_40 : f32 to vector<8x384xf32>
    %104 = arith.addf %102, %103 : vector<8x384xf32>
    %105 = vector.extract_strided_slice %96 {offsets = [0, 384], sizes = [8, 128], strides = [1, 1]} : vector<8x512xf32> to vector<8x128xf32>
    %106 = math.tanh %105 : vector<8x128xf32>
    %107 = vector.extract_strided_slice %104 {offsets = [0, 0], sizes = [8, 128], strides = [1, 1]} : vector<8x384xf32> to vector<8x128xf32>
    %108 = vector.extract_strided_slice %104 {offsets = [0, 128], sizes = [8, 128], strides = [1, 1]} : vector<8x384xf32> to vector<8x128xf32>
    %109 = vector.extract_strided_slice %104 {offsets = [0, 256], sizes = [8, 128], strides = [1, 1]} : vector<8x384xf32> to vector<8x128xf32>
    %110 = arith.mulf %108, %86 : vector<8x128xf32>
    %111 = arith.mulf %107, %106 : vector<8x128xf32>
    %112 = arith.addf %110, %111 : vector<8x128xf32>
    %113 = math.tanh %112 : vector<8x128xf32>
    %114 = arith.mulf %109, %113 : vector<8x128xf32>
    %115 = arith.index_cast %92 : i32 to index
    %c0_41 = arith.constant 0 : index
    %116 = vector.load %arg7[%115, %c0_41] : memref<64x128xf32, #tpu.memory_space<vmem>>, vector<8x128xf32>
    tpu.vector_store %arg7[%115, %c0_41], %114 {strides = array<i32>} : memref<64x128xf32, #tpu.memory_space<vmem>>, vector<8x128xf32>,
    %c4_i32 = arith.constant 4 : i32
    %c8_i32_42 = arith.constant 8 : i32
    %117 = arith.muli %c4_i32, %c8_i32_42 : i32
    %118 = tpu.assume_multiple %117, 8 : i32
    %119 = arith.index_cast %118 : i32 to index
    %c0_43 = arith.constant 0 : index
    %120 = vector.load %arg12[%119, %c0_43] : memref<64x512xf32, #tpu.memory_space<vmem>>, vector<8x512xf32>
    %cst_44 = arith.constant dense<0.000000e+00> : vector<8x512xf32>
    %121 = tpu.matmul %114, %10, %cst_44 {dimension_numbers = #tpu.dot_dimension_numbers<[1], [0], [0], [1], [0, 0, 1, 1], [], []>} : vector<8x128xf32>, vector<128x512xf32>, vector<8x512xf32> -> vector<8x512xf32>
    %122 = arith.addf %120, %121 : vector<8x512xf32>
    %123 = vector.extract_strided_slice %122 {offsets = [0, 0], sizes = [8, 384], strides = [1, 1]} : vector<8x512xf32> to vector<8x384xf32>
    %cst_45 = arith.constant 5.000000e-01 : f32
    %124 = vector.broadcast %cst_45 : f32 to vector<8x384xf32>
    %125 = arith.mulf %124, %123 : vector<8x384xf32>
    %126 = math.tanh %125 : vector<8x384xf32>
    %cst_46 = arith.constant 5.000000e-01 : f32
    %127 = vector.broadcast %cst_46 : f32 to vector<8x384xf32>
    %128 = arith.mulf %127, %126 : vector<8x384xf32>
    %cst_47 = arith.constant 5.000000e-01 : f32
    %129 = vector.broadcast %cst_47 : f32 to vector<8x384xf32>
    %130 = arith.addf %128, %129 : vector<8x384xf32>
    %131 = vector.extract_strided_slice %122 {offsets = [0, 384], sizes = [8, 128], strides = [1, 1]} : vector<8x512xf32> to vector<8x128xf32>
    %132 = math.tanh %131 : vector<8x128xf32>
    %133 = vector.extract_strided_slice %130 {offsets = [0, 0], sizes = [8, 128], strides = [1, 1]} : vector<8x384xf32> to vector<8x128xf32>
    %134 = vector.extract_strided_slice %130 {offsets = [0, 128], sizes = [8, 128], strides = [1, 1]} : vector<8x384xf32> to vector<8x128xf32>
    %135 = vector.extract_strided_slice %130 {offsets = [0, 256], sizes = [8, 128], strides = [1, 1]} : vector<8x384xf32> to vector<8x128xf32>
    %136 = arith.mulf %134, %112 : vector<8x128xf32>
    %137 = arith.mulf %133, %132 : vector<8x128xf32>
    %138 = arith.addf %136, %137 : vector<8x128xf32>
    %139 = math.tanh %138 : vector<8x128xf32>
    %140 = arith.mulf %135, %139 : vector<8x128xf32>
    %141 = arith.index_cast %118 : i32 to index
    %c0_48 = arith.constant 0 : index
    %142 = vector.load %arg7[%141, %c0_48] : memref<64x128xf32, #tpu.memory_space<vmem>>, vector<8x128xf32>
    tpu.vector_store %arg7[%141, %c0_48], %140 {strides = array<i32>} : memref<64x128xf32, #tpu.memory_space<vmem>>, vector<8x128xf32>,
    %c5_i32 = arith.constant 5 : i32
    %c8_i32_49 = arith.constant 8 : i32
    %143 = arith.muli %c5_i32, %c8_i32_49 : i32
    %144 = tpu.assume_multiple %143, 8 : i32
    %145 = arith.index_cast %144 : i32 to index
    %c0_50 = arith.constant 0 : index
    %146 = vector.load %arg12[%145, %c0_50] : memref<64x512xf32, #tpu.memory_space<vmem>>, vector<8x512xf32>
    %cst_51 = arith.constant dense<0.000000e+00> : vector<8x512xf32>
    %147 = tpu.matmul %140, %10, %cst_51 {dimension_numbers = #tpu.dot_dimension_numbers<[1], [0], [0], [1], [0, 0, 1, 1], [], []>} : vector<8x128xf32>, vector<128x512xf32>, vector<8x512xf32> -> vector<8x512xf32>
    %148 = arith.addf %146, %147 : vector<8x512xf32>
    %149 = vector.extract_strided_slice %148 {offsets = [0, 0], sizes = [8, 384], strides = [1, 1]} : vector<8x512xf32> to vector<8x384xf32>
    %cst_52 = arith.constant 5.000000e-01 : f32
    %150 = vector.broadcast %cst_52 : f32 to vector<8x384xf32>
    %151 = arith.mulf %150, %149 : vector<8x384xf32>
    %152 = math.tanh %151 : vector<8x384xf32>
    %cst_53 = arith.constant 5.000000e-01 : f32
    %153 = vector.broadcast %cst_53 : f32 to vector<8x384xf32>
    %154 = arith.mulf %153, %152 : vector<8x384xf32>
    %cst_54 = arith.constant 5.000000e-01 : f32
    %155 = vector.broadcast %cst_54 : f32 to vector<8x384xf32>
    %156 = arith.addf %154, %155 : vector<8x384xf32>
    %157 = vector.extract_strided_slice %148 {offsets = [0, 384], sizes = [8, 128], strides = [1, 1]} : vector<8x512xf32> to vector<8x128xf32>
    %158 = math.tanh %157 : vector<8x128xf32>
    %159 = vector.extract_strided_slice %156 {offsets = [0, 0], sizes = [8, 128], strides = [1, 1]} : vector<8x384xf32> to vector<8x128xf32>
    %160 = vector.extract_strided_slice %156 {offsets = [0, 128], sizes = [8, 128], strides = [1, 1]} : vector<8x384xf32> to vector<8x128xf32>
    %161 = vector.extract_strided_slice %156 {offsets = [0, 256], sizes = [8, 128], strides = [1, 1]} : vector<8x384xf32> to vector<8x128xf32>
    %162 = arith.mulf %160, %138 : vector<8x128xf32>
    %163 = arith.mulf %159, %158 : vector<8x128xf32>
    %164 = arith.addf %162, %163 : vector<8x128xf32>
    %165 = math.tanh %164 : vector<8x128xf32>
    %166 = arith.mulf %161, %165 : vector<8x128xf32>
    %167 = arith.index_cast %144 : i32 to index
    %c0_55 = arith.constant 0 : index
    %168 = vector.load %arg7[%167, %c0_55] : memref<64x128xf32, #tpu.memory_space<vmem>>, vector<8x128xf32>
    tpu.vector_store %arg7[%167, %c0_55], %166 {strides = array<i32>} : memref<64x128xf32, #tpu.memory_space<vmem>>, vector<8x128xf32>,
    %c6_i32 = arith.constant 6 : i32
    %c8_i32_56 = arith.constant 8 : i32
    %169 = arith.muli %c6_i32, %c8_i32_56 : i32
    %170 = tpu.assume_multiple %169, 8 : i32
    %171 = arith.index_cast %170 : i32 to index
    %c0_57 = arith.constant 0 : index
    %172 = vector.load %arg12[%171, %c0_57] : memref<64x512xf32, #tpu.memory_space<vmem>>, vector<8x512xf32>
    %cst_58 = arith.constant dense<0.000000e+00> : vector<8x512xf32>
    %173 = tpu.matmul %166, %10, %cst_58 {dimension_numbers = #tpu.dot_dimension_numbers<[1], [0], [0], [1], [0, 0, 1, 1], [], []>} : vector<8x128xf32>, vector<128x512xf32>, vector<8x512xf32> -> vector<8x512xf32>
    %174 = arith.addf %172, %173 : vector<8x512xf32>
    %175 = vector.extract_strided_slice %174 {offsets = [0, 0], sizes = [8, 384], strides = [1, 1]} : vector<8x512xf32> to vector<8x384xf32>
    %cst_59 = arith.constant 5.000000e-01 : f32
    %176 = vector.broadcast %cst_59 : f32 to vector<8x384xf32>
    %177 = arith.mulf %176, %175 : vector<8x384xf32>
    %178 = math.tanh %177 : vector<8x384xf32>
    %cst_60 = arith.constant 5.000000e-01 : f32
    %179 = vector.broadcast %cst_60 : f32 to vector<8x384xf32>
    %180 = arith.mulf %179, %178 : vector<8x384xf32>
    %cst_61 = arith.constant 5.000000e-01 : f32
    %181 = vector.broadcast %cst_61 : f32 to vector<8x384xf32>
    %182 = arith.addf %180, %181 : vector<8x384xf32>
    %183 = vector.extract_strided_slice %174 {offsets = [0, 384], sizes = [8, 128], strides = [1, 1]} : vector<8x512xf32> to vector<8x128xf32>
    %184 = math.tanh %183 : vector<8x128xf32>
    %185 = vector.extract_strided_slice %182 {offsets = [0, 0], sizes = [8, 128], strides = [1, 1]} : vector<8x384xf32> to vector<8x128xf32>
    %186 = vector.extract_strided_slice %182 {offsets = [0, 128], sizes = [8, 128], strides = [1, 1]} : vector<8x384xf32> to vector<8x128xf32>
    %187 = vector.extract_strided_slice %182 {offsets = [0, 256], sizes = [8, 128], strides = [1, 1]} : vector<8x384xf32> to vector<8x128xf32>
    %188 = arith.mulf %186, %164 : vector<8x128xf32>
    %189 = arith.mulf %185, %184 : vector<8x128xf32>
    %190 = arith.addf %188, %189 : vector<8x128xf32>
    %191 = math.tanh %190 : vector<8x128xf32>
    %192 = arith.mulf %187, %191 : vector<8x128xf32>
    %193 = arith.index_cast %170 : i32 to index
    %c0_62 = arith.constant 0 : index
    %194 = vector.load %arg7[%193, %c0_62] : memref<64x128xf32, #tpu.memory_space<vmem>>, vector<8x128xf32>
    tpu.vector_store %arg7[%193, %c0_62], %192 {strides = array<i32>} : memref<64x128xf32, #tpu.memory_space<vmem>>, vector<8x128xf32>,
    %c7_i32 = arith.constant 7 : i32
    %c8_i32_63 = arith.constant 8 : i32
    %195 = arith.muli %c7_i32, %c8_i32_63 : i32
    %196 = tpu.assume_multiple %195, 8 : i32
    %197 = arith.index_cast %196 : i32 to index
    %c0_64 = arith.constant 0 : index
    %198 = vector.load %arg12[%197, %c0_64] : memref<64x512xf32, #tpu.memory_space<vmem>>, vector<8x512xf32>
    %cst_65 = arith.constant dense<0.000000e+00> : vector<8x512xf32>
    %199 = tpu.matmul %192, %10, %cst_65 {dimension_numbers = #tpu.dot_dimension_numbers<[1], [0], [0], [1], [0, 0, 1, 1], [], []>} : vector<8x128xf32>, vector<128x512xf32>, vector<8x512xf32> -> vector<8x512xf32>
    %200 = arith.addf %198, %199 : vector<8x512xf32>
    %201 = vector.extract_strided_slice %200 {offsets = [0, 0], sizes = [8, 384], strides = [1, 1]} : vector<8x512xf32> to vector<8x384xf32>
    %cst_66 = arith.constant 5.000000e-01 : f32
    %202 = vector.broadcast %cst_66 : f32 to vector<8x384xf32>
    %203 = arith.mulf %202, %201 : vector<8x384xf32>
    %204 = math.tanh %203 : vector<8x384xf32>
    %cst_67 = arith.constant 5.000000e-01 : f32
    %205 = vector.broadcast %cst_67 : f32 to vector<8x384xf32>
    %206 = arith.mulf %205, %204 : vector<8x384xf32>
    %cst_68 = arith.constant 5.000000e-01 : f32
    %207 = vector.broadcast %cst_68 : f32 to vector<8x384xf32>
    %208 = arith.addf %206, %207 : vector<8x384xf32>
    %209 = vector.extract_strided_slice %200 {offsets = [0, 384], sizes = [8, 128], strides = [1, 1]} : vector<8x512xf32> to vector<8x128xf32>
    %210 = math.tanh %209 : vector<8x128xf32>
    %211 = vector.extract_strided_slice %208 {offsets = [0, 0], sizes = [8, 128], strides = [1, 1]} : vector<8x384xf32> to vector<8x128xf32>
    %212 = vector.extract_strided_slice %208 {offsets = [0, 128], sizes = [8, 128], strides = [1, 1]} : vector<8x384xf32> to vector<8x128xf32>
    %213 = vector.extract_strided_slice %208 {offsets = [0, 256], sizes = [8, 128], strides = [1, 1]} : vector<8x384xf32> to vector<8x128xf32>
    %214 = arith.mulf %212, %190 : vector<8x128xf32>
    %215 = arith.mulf %211, %210 : vector<8x128xf32>
    %216 = arith.addf %214, %215 : vector<8x128xf32>
    %217 = math.tanh %216 : vector<8x128xf32>
    %218 = arith.mulf %213, %217 : vector<8x128xf32>
    %219 = arith.index_cast %196 : i32 to index
    %c0_69 = arith.constant 0 : index
    %220 = vector.load %arg7[%219, %c0_69] : memref<64x128xf32, #tpu.memory_space<vmem>>, vector<8x128xf32>
    tpu.vector_store %arg7[%219, %c0_69], %218 {strides = array<i32>} : memref<64x128xf32, #tpu.memory_space<vmem>>, vector<8x128xf32>,
    %c8_i32_70 = arith.constant 8 : i32
    %c0_71 = arith.constant 0 : index
    %c0_72 = arith.constant 0 : index
    %221 = vector.load %arg10[%c0_71, %c0_72] : memref<8x128xf32, #tpu.memory_space<vmem>>, vector<8x128xf32>
    tpu.vector_store %arg10[%c0_71, %c0_72], %218 {strides = array<i32>} : memref<8x128xf32, #tpu.memory_space<vmem>>, vector<8x128xf32>,
    %c0_73 = arith.constant 0 : index
    %c0_74 = arith.constant 0 : index
    %222 = vector.load %arg11[%c0_73, %c0_74] : memref<8x128xf32, #tpu.memory_space<vmem>>, vector<8x128xf32>
    tpu.vector_store %arg11[%c0_73, %c0_74], %216 {strides = array<i32>} : memref<8x128xf32, #tpu.memory_space<vmem>>, vector<8x128xf32>,
    %c0_i32_75 = arith.constant 0 : i32
    %223 = arith.cmpi eq, %arg0, %c0_i32_75 : i32
    %224 = arith.extui %223 : i1 to i32
    %c0_i32_76 = arith.constant 0 : i32
    %225 = arith.cmpi ne, %224, %c0_i32_76 : i32
    scf.if %225 {
      %c0_77 = arith.constant 0 : index
      %c0_78 = arith.constant 0 : index
      %226 = vector.load %arg8[%c0_77, %c0_78] : memref<8x128xf32, #tpu.memory_space<vmem>>, vector<8x128xf32>
      tpu.vector_store %arg8[%c0_77, %c0_78], %218 {strides = array<i32>} : memref<8x128xf32, #tpu.memory_space<vmem>>, vector<8x128xf32>,
      %c0_79 = arith.constant 0 : index
      %c0_80 = arith.constant 0 : index
      %227 = vector.load %arg9[%c0_79, %c0_80] : memref<8x128xf32, #tpu.memory_space<vmem>>, vector<8x128xf32>
      tpu.vector_store %arg9[%c0_79, %c0_80], %216 {strides = array<i32>} : memref<8x128xf32, #tpu.memory_space<vmem>>, vector<8x128xf32>,
    } else {
    }
    return
  }
  func.func @transform_0(%arg0: i32) -> (i32, i32) {
    %c0_i32 = arith.constant 0 : i32
    %c0_i32_0 = arith.constant 0 : i32
    return %arg0, %c0_i32 : i32, i32
  }
  func.func @transform_1(%arg0: i32) -> (i32, i32) {
    %c0_i32 = arith.constant 0 : i32
    %c0_i32_0 = arith.constant 0 : i32
    %c0_i32_1 = arith.constant 0 : i32
    return %c0_i32, %c0_i32_0 : i32, i32
  }
  func.func @transform_2(%arg0: i32) -> (i32, i32) {
    %c0_i32 = arith.constant 0 : i32
    %c0_i32_0 = arith.constant 0 : i32
    %c0_i32_1 = arith.constant 0 : i32
    return %c0_i32, %c0_i32_0 : i32, i32
  }
  func.func @transform_3(%arg0: i32) -> (i32, i32) {
    %c0_i32 = arith.constant 0 : i32
    %c0_i32_0 = arith.constant 0 : i32
    %c0_i32_1 = arith.constant 0 : i32
    return %c0_i32, %c0_i32_0 : i32, i32
  }
  func.func @transform_4(%arg0: i32) -> (i32, i32) {
    %c0_i32 = arith.constant 0 : i32
    %c0_i32_0 = arith.constant 0 : i32
    %c0_i32_1 = arith.constant 0 : i32
    return %c0_i32, %c0_i32_0 : i32, i32
  }
  func.func @transform_5(%arg0: i32) -> (i32, i32) {
    %c0_i32 = arith.constant 0 : i32
    %c0_i32_0 = arith.constant 0 : i32
    %c0_i32_1 = arith.constant 0 : i32
    return %c0_i32, %c0_i32_0 : i32, i32
  }
  func.func @transform_6(%arg0: i32) -> (i32, i32) {
    %c0_i32 = arith.constant 0 : i32
    %c0_i32_0 = arith.constant 0 : i32
    return %arg0, %c0_i32 : i32, i32
  }
  func.func @transform_7(%arg0: i32) -> (i32, i32) {
    %c0_i32 = arith.constant 0 : i32
    %c0_i32_0 = arith.constant 0 : i32
    %c0_i32_1 = arith.constant 0 : i32
    return %c0_i32, %c0_i32_0 : i32, i32
  }
  func.func @transform_8(%arg0: i32) -> (i32, i32) {
    %c0_i32 = arith.constant 0 : i32
    %c0_i32_0 = arith.constant 0 : i32
    %c0_i32_1 = arith.constant 0 : i32
    return %c0_i32, %c0_i32_0 : i32, i32
  }
}

</mosaic_0001>

<bundles_post_ra>
// kernel: tpu_custom_call.1
= control target key start
LH: loop header
LB: loop body
LE: loop exit
PB: predicated region body
PF: predicated region fallthrough
CT: control target
= control target key end

     0   :  { %14 = vsyncpa [#allocation6], 0  ;;  %s3212_s0 = inlined_call_operand.vmem [shape: f32[64,16], index: 0, kind: input, shape index: {}]   ;;  %s3213_s1 = inlined_call_operand.vmem [shape: f32[8,128], index: 1, kind: input, shape index: {}]   ;;  %s3214_s2 = inlined_call_operand.vmem [shape: f32[8,128], index: 2, kind: input, shape index: {}]   ;;  %s3215_s3 = inlined_call_operand.vmem [shape: f32[16,512], index: 3, kind: input, shape index: {}]   ;;  %s3216_s4 = inlined_call_operand.hbm [shape: f32[128,512], index: 4, kind: input, shape index: {}]   ;;  %s3217_s5 = inlined_call_operand.vmem [shape: f32[1,512], index: 5, kind: input, shape index: {}]   ;;  %s3218_s6 = inlined_call_operand.hbm [shape: f32[64,128], index: 6, kind: output, shape index: {0}]   ;;  %s3219_s7 = inlined_call_operand.hbm [shape: f32[8,128], index: 7, kind: output, shape index: {1}]   ;;  %s3220_s8 = inlined_call_operand.hbm [shape: f32[8,128], index: 8, kind: output, shape index: {2}]  }
   0x1   :  { %15 = vsyncpa [#allocation7], 0 }
   0x2   :  { %16 = vsyncpa [#allocation10], 0  ;;  %s2133_s27 = smov [#allocation5]  }
   0x3   :  { %s30_s28 = sshll.u32 %s2133_s27, 4  ;;  %s31_s28 = int_to_ptr.vmem [resolvable:$true] %s30_s28 }
   0x4   :  { %s2055_s29 = scalar_lea.vmem %s31_s28, 8192  ;;  %p2060_p1 = scmp.lt.s32.totalorder %s31_s28, %s31_s28 }
   0x5   :  { %p2056_p0 = scmp.ne.s32.totalorder %s31_s28, %s2055_s29  ;;  %p2061_p2 = scmp.lt.s32.totalorder %s2055_s29, %s2055_s29 }
   0x7   :  { %p2062_p3 = por %p2061_p2, %p2060_p1 }
   0x9   :  { %p2063_p4 = pnand %p2062_p3, %p2056_p0 }
   0xb   :  { %2066 = shalt.err (!%p2063_p4)
}
   0xc   :  { %s2134_s30 = smov 512   ;;  %s2135_s9 = smov 32  }
   0xd   :  { %36 = dma.hbm_to_vmem [thread:$0]  %s3216_s4, 8192, %s31_s28, [#allocation6], %s2134_s30, %s2134_s30, %s2135_s9  }
   0xe   :  { %2127 = dma.done.wait [#allocation6], 8192  }
   0xf   :  { %2128 = vsyncadd [#allocation6], 4294959104  ;;  %v3221_v0 = vmov 0.0   ;;  %v63_v1 = vld [vmem:[%s3215_s3 + $0x28] sm:$0xff]  ;;  %v65_v2 = vld [vmem:[%s3215_s3 + $0x38] sm:$0xff]  ;;  %vm88_vm0 = vcmask 130048  }
  0x10   :  { %177 = vmatprep.mubr.f32.mxu0 %v3221_v0  ;;  %290 = vmatprep.mubr.f32.mxu1 %v3221_v0  ;;  %v62_v3 = vld [vmem:[%s3215_s3 + $0x20] sm:$0xff]  ;;  %v64_v4 = vld [vmem:[%s3215_s3 + $0x30] sm:$0xff]  ;;  %v59_v5 = vld [vmem:[%s3215_s3 + $0x8] sm:$0xff]  ;;  %s2138_s23 = smov [#allocation8]   ;;  %s2139_s25 = smov [#allocation11]  }
  0x11   :  { %141 = vmatprep.subr.mxu0 %v63_v1  ;;  %254 = vmatprep.subr.mxu1 %v65_v2  ;;  %v61_v6 = vld [vmem:[%s3215_s3 + $0x18] sm:$0xff]  ;;  %v58_v7 = vld [vmem:[%s3215_s3] sm:$0xff]  ;;  %v60_v8 = vld [vmem:[%s3215_s3 + $0x10] sm:$0xff]  ;;  %s1832_s24 = sshll.u32 %s2138_s23, 4  ;;  %s1855_s26 = sshll.u32 %s2139_s25, 4  ;;  %s1833_s24 = int_to_ptr.vmem [resolvable:$true] %s1832_s24  ;;  %s1856_s26 = int_to_ptr.vmem [resolvable:$true] %s1855_s26 }
  0x12   :  { %142 = vmatpush1.msra.mxu0 %v62_v3  ;;  %255 = vmatpush1.msra.mxu1 %v64_v4  ;;  %v50_v9 = vld [vmem:[%s3212_s0] sm:$0xff]  ;;  %v2219_v10 = vld [vmem:[#allocation5 + $0x1e8] sm:$0xff]  ;;  %v2221_v11 = vld [vmem:[#allocation5 + $0x1f8] sm:$0xff] }
  0x13   :  { %143 = vmatprep.subr.mxu0 %v59_v5  ;;  %256 = vmatprep.subr.mxu1 %v61_v6  ;;  %3315 = vst [vmem:[#allocation15_spill] sm:$0xff] %v2219_v10  ;;  %3316 = vst [vmem:[#allocation16_spill] sm:$0xff] %v2221_v11  ;;  %v2223_v12 = vld [vmem:[#allocation5 + $0x1e0] sm:$0xff]  ;;  %v2225_v13 = vld [vmem:[#allocation5 + $0x1f0] sm:$0xff] }
  0x14   :  { %144 = vmatpush1.msra.mxu0 %v58_v7  ;;  %257 = vmatpush1.msra.mxu1 %v60_v8  ;;  %v2229_v14 = vld [vmem:[#allocation5 + $0x1c8] sm:$0xff]  ;;  %v2231_v15 = vld [vmem:[#allocation5 + $0x1d8] sm:$0xff]  ;;  %v2237_v16 = vld [vmem:[#allocation5 + $0x1c0] sm:$0xff] }
  0x15   :  { %1878 = vmatmul.mubr.msk.f32.vlgmr.msra.gmra.mxu0 %vm88_vm0, %v50_v9  ;;  %1886 = vmatmul.mubr.msk.f32.vlgmr.msra.gmra.mxu1 %vm88_vm0, %v50_v9  ;;  %v2239_v17 = vld [vmem:[#allocation5 + $0x1d0] sm:$0xff]  ;;  %v51_v18 = vld [vmem:[%s3212_s0 + $0x8] sm:$0xff]  ;;  %v2250_v20 = vld [vmem:[#allocation5 + $0x1b8] sm:$0xff] }
  0x16   :  { %444 = vmatprep.subr.mxu0 %v2219_v10  ;;  %515 = vmatprep.subr.mxu1 %v2221_v11  ;;  %v2248_v19 = vld [vmem:[#allocation5 + $0x1a8] sm:$0xff]  ;;  %v2254_v21 = vld [vmem:[#allocation5 + $0x1a0] sm:$0xff]  ;;  %v2256_v22 = vld [vmem:[#allocation5 + $0x1b0] sm:$0xff] }
  0x17   :  { %445 = vmatpush1.msra.mxu0 %v2223_v12  ;;  %516 = vmatpush1.msra.mxu1 %v2225_v13  ;;  %v2260_v23 = vld [vmem:[#allocation5 + $0x188] sm:$0xff]  ;;  %v2262_v24 = vld [vmem:[#allocation5 + $0x198] sm:$0xff]  ;;  %v2268_v25 = vld [vmem:[#allocation5 + $0x180] sm:$0xff] }
  0x18   :  { %446 = vmatprep.subr.mxu0 %v2229_v14  ;;  %517 = vmatprep.subr.mxu1 %v2231_v15  ;;  %v2270_v26 = vld [vmem:[#allocation5 + $0x190] sm:$0xff]  ;;  %v2279_v28 = vld [vmem:[#allocation5 + $0x168] sm:$0xff]  ;;  %v2281_v29 = vld [vmem:[#allocation5 + $0x178] sm:$0xff] }
  0x19   :  { %183 = vmatprep.mubr.f32.mxu0 %v3221_v0  ;;  %296 = vmatprep.mubr.f32.mxu1 %v3221_v0  ;;  %v52_v27 = vld [vmem:[%s3212_s0 + $0x10] sm:$0xff]  ;;  %v2285_v30 = vld [vmem:[#allocation5 + $0x160] sm:$0xff]  ;;  %v2291_v32 = vld [vmem:[#allocation5 + $0x148] sm:$0xff] }
  0x1a   :  { %447 = vmatpush1.msra.mxu0 %v2237_v16  ;;  %518 = vmatpush1.msra.mxu1 %v2239_v17  ;;  %v2287_v31 = vld [vmem:[#allocation5 + $0x170] sm:$0xff]  ;;  %v2293_v33 = vld [vmem:[#allocation5 + $0x158] sm:$0xff]  ;;  %v2299_v34 = vld [vmem:[#allocation5 + $0x140] sm:$0xff] }
  0x1b   :  { %1879 = vmatmul.mubr.msk.f32.gmra.mxu0 %vm88_vm0, %v51_v18  ;;  %1887 = vmatmul.mubr.msk.f32.gmra.mxu1 %vm88_vm0, %v51_v18  ;;  %v2301_v35 = vld [vmem:[#allocation5 + $0x150] sm:$0xff]  ;;  %v53_v36 = vld [vmem:[%s3212_s0 + $0x18] sm:$0xff]  ;;  %v2310_v37 = vld [vmem:[#allocation5 + $0x128] sm:$0xff] }
  0x1c   :  { %448 = vmatprep.subr.mxu0 %v2248_v19  ;;  %519 = vmatprep.subr.mxu1 %v2250_v20  ;;  %v2312_v38 = vld [vmem:[#allocation5 + $0x138] sm:$0xff]  ;;  %v2316_v39 = vld [vmem:[#allocation5 + $0x120] sm:$0xff]  ;;  %v2318_v40 = vld [vmem:[#allocation5 + $0x130] sm:$0xff] }
  0x1d   :  { %449 = vmatpush1.msra.mxu0 %v2254_v21  ;;  %520 = vmatpush1.msra.mxu1 %v2256_v22  ;;  %v2322_v41 = vld [vmem:[#allocation5 + $0x108] sm:$0xff]  ;;  %v2324_v42 = vld [vmem:[#allocation5 + $0x118] sm:$0xff]  ;;  %v2330_v43 = vld [vmem:[#allocation5 + $0x100] sm:$0xff] }
  0x1e   :  { %450 = vmatprep.subr.mxu0 %v2260_v23  ;;  %521 = vmatprep.subr.mxu1 %v2262_v24  ;;  %v2332_v44 = vld [vmem:[#allocation5 + $0x110] sm:$0xff]  ;;  %v54_v45 = vld [vmem:[%s3212_s0 + $0x20] sm:$0xff]  ;;  %v2341_v46 = vld [vmem:[#allocation5 + $0xe8] sm:$0xff] }
  0x1f   :  { %189 = vmatprep.mubr.f32.mxu0 %v3221_v0  ;;  %302 = vmatprep.mubr.f32.mxu1 %v3221_v0  ;;  %v2343_v47 = vld [vmem:[#allocation5 + $0xf8] sm:$0xff]  ;;  %v2347_v48 = vld [vmem:[#allocation5 + $0xe0] sm:$0xff]  ;;  %v2349_v49 = vld [vmem:[#allocation5 + $0xf0] sm:$0xff] }
  0x20   :  { %451 = vmatpush1.msra.mxu0 %v2268_v25  ;;  %522 = vmatpush1.msra.mxu1 %v2270_v26  ;;  %v2353_v50 = vld [vmem:[#allocation5 + $0xc8] sm:$0xff]  ;;  %v2355_v51 = vld [vmem:[#allocation5 + $0xd8] sm:$0xff]  ;;  %v2361_v52 = vld [vmem:[#allocation5 + $0xc0] sm:$0xff] }
  0x21   :  { %1880 = vmatmul.mubr.msk.f32.gmra.mxu0 %vm88_vm0, %v52_v27  ;;  %1888 = vmatmul.mubr.msk.f32.gmra.mxu1 %vm88_vm0, %v52_v27  ;;  %v2363_v53 = vld [vmem:[#allocation5 + $0xd0] sm:$0xff]  ;;  %v55_v54 = vld [vmem:[%s3212_s0 + $0x28] sm:$0xff]  ;;  %v2374_v56 = vld [vmem:[#allocation5 + $0xb8] sm:$0xff] }
  0x22   :  { %452 = vmatprep.subr.mxu0 %v2279_v28  ;;  %523 = vmatprep.subr.mxu1 %v2281_v29  ;;  %v2372_v55 = vld [vmem:[#allocation5 + $0xa8] sm:$0xff]  ;;  %v2378_v57 = vld [vmem:[#allocation5 + $0xa0] sm:$0xff]  ;;  %v2380_v58 = vld [vmem:[#allocation5 + $0xb0] sm:$0xff] }
  0x23   :  { %453 = vmatpush1.msra.mxu0 %v2285_v30  ;;  %524 = vmatpush1.msra.mxu1 %v2287_v31  ;;  %3317 = vst [vmem:[#allocation17_spill] sm:$0xff] %v2380_v58  ;;  %v2384_v59 = vld [vmem:[#allocation5 + $0x88] sm:$0xff]  ;;  %v2386_v60 = vld [vmem:[#allocation5 + $0x98] sm:$0xff]  ;;  %v2392_v61 = vld [vmem:[#allocation5 + $0x80] sm:$0xff] }
  0x24   :  { %454 = vmatprep.subr.mxu0 %v2291_v32  ;;  %525 = vmatprep.subr.mxu1 %v2293_v33  ;;  %3318 = vst [vmem:[#allocation18_spill] sm:$0xff] %v2384_v59  ;;  %3319 = vst [vmem:[#allocation19_spill] sm:$0xff] %v2386_v60  ;;  %v2394_v62 = vld [vmem:[#allocation5 + $0x90] sm:$0xff]  ;;  %v2403_v1 = vld [vmem:[#allocation5 + $0x68] sm:$0xff] }
  0x25   :  { %195 = vmatprep.mubr.f32.mxu0 %v3221_v0  ;;  %308 = vmatprep.mubr.f32.mxu1 %v3221_v0  ;;  %3320 = vst [vmem:[#allocation20_spill] sm:$0xff] %v2392_v61  ;;  %3321 = vst [vmem:[#allocation21_spill] sm:$0xff] %v2394_v62  ;;  %v56_v63 = vld [vmem:[%s3212_s0 + $0x30] sm:$0xff]  ;;  %v2405_v2 = vld [vmem:[#allocation5 + $0x78] sm:$0xff] }
  0x26   :  { %455 = vmatpush1.msra.mxu0 %v2299_v34  ;;  %526 = vmatpush1.msra.mxu1 %v2301_v35  ;;  %3322 = vst [vmem:[#allocation22_spill] sm:$0xff] %v2403_v1  ;;  %3323 = vst [vmem:[#allocation23_spill] sm:$0xff] %v2405_v2  ;;  %v2409_v3 = vld [vmem:[#allocation5 + $0x60] sm:$0xff]  ;;  %v2411_v4 = vld [vmem:[#allocation5 + $0x70] sm:$0xff] }
  0x27   :  { %1881 = vmatmul.mubr.msk.f32.gmra.mxu0 %vm88_vm0, %v53_v36  ;;  %1889 = vmatmul.mubr.msk.f32.gmra.mxu1 %vm88_vm0, %v53_v36  ;;  %3324 = vst [vmem:[#allocation24_spill] sm:$0xff] %v2409_v3  ;;  %3325 = vst [vmem:[#allocation25_spill] sm:$0xff] %v2411_v4  ;;  %v2415_v5 = vld [vmem:[#allocation5 + $0x48] sm:$0xff]  ;;  %v2417_v6 = vld [vmem:[#allocation5 + $0x58] sm:$0xff] }
  0x28   :  { %456 = vmatprep.subr.mxu0 %v2310_v37  ;;  %527 = vmatprep.subr.mxu1 %v2312_v38  ;;  %3326 = vst [vmem:[#allocation26_spill] sm:$0xff] %v2415_v5  ;;  %3327 = vst [vmem:[#allocation27_spill] sm:$0xff] %v2417_v6  ;;  %v2423_v7 = vld [vmem:[#allocation5 + $0x40] sm:$0xff]  ;;  %v2425_v8 = vld [vmem:[#allocation5 + $0x50] sm:$0xff] }
  0x29   :  { %457 = vmatpush1.msra.mxu0 %v2316_v39  ;;  %528 = vmatpush1.msra.mxu1 %v2318_v40  ;;  %3328 = vst [vmem:[#allocation28_spill] sm:$0xff] %v2423_v7  ;;  %3329 = vst [vmem:[#allocation29_spill] sm:$0xff] %v2425_v8  ;;  %v57_v9 = vld [vmem:[%s3212_s0 + $0x38] sm:$0xff]  ;;  %v2434_v18 = vld [vmem:[#allocation5 + $0x28] sm:$0xff] }
  0x2a   :  { %458 = vmatprep.subr.mxu0 %v2322_v41  ;;  %529 = vmatprep.subr.mxu1 %v2324_v42  ;;  %3330 = vst [vmem:[#allocation30_spill] sm:$0xff] %v2434_v18  ;;  %v2436_v27 = vld [vmem:[#allocation5 + $0x38] sm:$0xff]  ;;  %v2440_v36 = vld [vmem:[#allocation5 + $0x20] sm:$0xff] }
  0x2b   :  { %201 = vmatprep.mubr.f32.mxu0 %v3221_v0  ;;  %314 = vmatprep.mubr.f32.mxu1 %v3221_v0  ;;  %3331 = vst [vmem:[#allocation31_spill] sm:$0xff] %v2436_v27  ;;  %3332 = vst [vmem:[#allocation32_spill] sm:$0xff] %v2440_v36 }
  0x2c   :  { %459 = vmatpush1.msra.mxu0 %v2330_v43  ;;  %530 = vmatpush1.msra.mxu1 %v2332_v44 }
  0x2d   :  { %1882 = vmatmul.mubr.msk.f32.gmra.mxu0 %vm88_vm0, %v54_v45  ;;  %1890 = vmatmul.mubr.msk.f32.gmra.mxu1 %vm88_vm0, %v54_v45  ;;  %v2442_v45 = vld [vmem:[#allocation5 + $0x30] sm:$0xff] }
  0x2e   :  { %460 = vmatprep.subr.mxu0 %v2341_v46  ;;  %531 = vmatprep.subr.mxu1 %v2343_v47  ;;  %3333 = vst [vmem:[#allocation33_spill] sm:$0xff] %v2442_v45 }
  0x2f   :  { %461 = vmatpush1.msra.mxu0 %v2347_v48  ;;  %532 = vmatpush1.msra.mxu1 %v2349_v49 }
  0x30   :  { %462 = vmatprep.subr.mxu0 %v2353_v50  ;;  %533 = vmatprep.subr.mxu1 %v2355_v51 }
  0x31   :  { %207 = vmatprep.mubr.f32.mxu0 %v3221_v0  ;;  %320 = vmatprep.mubr.f32.mxu1 %v3221_v0 }
  0x32   :  { %463 = vmatpush1.msra.mxu0 %v2361_v52  ;;  %534 = vmatpush1.msra.mxu1 %v2363_v53 }
  0x33   :  { %1883 = vmatmul.mubr.msk.f32.gmra.mxu0 %vm88_vm0, %v55_v54  ;;  %1891 = vmatmul.mubr.msk.f32.gmra.mxu1 %vm88_vm0, %v55_v54  ;;  %v2446_v54 = vld [vmem:[#allocation5 + $0x8] sm:$0xff] }
  0x34   :  { %464 = vmatprep.subr.mxu0 %v2372_v55  ;;  %535 = vmatprep.subr.mxu1 %v2374_v56  ;;  %3334 = vst [vmem:[#allocation34_spill] sm:$0xff] %v2446_v54 }
  0x35   :  { %465 = vmatpush1.msra.mxu0 %v2378_v57  ;;  %536 = vmatpush1.msra.mxu1 %v2380_v58 }
  0x36   :  { %466 = vmatprep.subr.mxu0 %v2384_v59  ;;  %537 = vmatprep.subr.mxu1 %v2386_v60 }
  0x37   :  { %213 = vmatprep.mubr.f32.mxu0 %v3221_v0  ;;  %326 = vmatprep.mubr.f32.mxu1 %v3221_v0 }
  0x38   :  { %467 = vmatpush1.msra.mxu0 %v2392_v61  ;;  %538 = vmatpush1.msra.mxu1 %v2394_v62 }
  0x39   :  { %1884 = vmatmul.mubr.msk.f32.gmra.mxu0 %vm88_vm0, %v56_v63  ;;  %1892 = vmatmul.mubr.msk.f32.gmra.mxu1 %vm88_vm0, %v56_v63  ;;  %v2448_v63 = vld [vmem:[#allocation5 + $0x18] sm:$0xff] }
  0x3a   :  { %468 = vmatprep.subr.mxu0 %v2403_v1  ;;  %539 = vmatprep.subr.mxu1 %v2405_v2  ;;  %3335 = vst [vmem:[#allocation35_spill] sm:$0xff] %v2448_v63 }
  0x3b   :  { %469 = vmatpush1.msra.mxu0 %v2409_v3  ;;  %540 = vmatpush1.msra.mxu1 %v2411_v4 }
  0x3c   :  { %470 = vmatprep.subr.mxu0 %v2415_v5  ;;  %541 = vmatprep.subr.mxu1 %v2417_v6 }
  0x3d   :  { %219 = vmatprep.mubr.f32.mxu0 %v3221_v0  ;;  %332 = vmatprep.mubr.f32.mxu1 %v3221_v0  ;;  %v2452_v0 = vld [vmem:[#allocation5] sm:$0xff] }
  0x3e   :  { %471 = vmatpush1.msra.mxu0 %v2423_v7  ;;  %542 = vmatpush1.msra.mxu1 %v2425_v8  ;;  %3336 = vst [vmem:[#allocation36_spill] sm:$0xff] %v2452_v0  ;;  %v2456_v8 = vld [vmem:[#allocation5 + $0x10] sm:$0xff] }
  0x3f   :  { %1885 = vmatmul.mubr.msk.f32.gmra.mxu0 %vm88_vm0, %v57_v9  ;;  %1893 = vmatmul.mubr.msk.f32.gmra.mxu1 %vm88_vm0, %v57_v9  ;;  %3337 = vst [vmem:[#allocation37_spill] sm:$0xff] %v2456_v8  ;;  %v46_v9 = vld [vmem:[%s3213_s1] sm:$0xff] }
  0x40   :  { %472 = vmatprep.subr.mxu0 %v2434_v18  ;;  %543 = vmatprep.subr.mxu1 %v2436_v27  ;;  %v3338_v18 = vmov 0.0  }
  0x41   :  { %473 = vmatpush1.msra.mxu0 %v2440_v36  ;;  %544 = vmatpush1.msra.mxu1 %v2442_v45 }
  0x42   :  { %474 = vmatprep.subr.mxu0 %v2446_v54  ;;  %545 = vmatprep.subr.mxu1 %v2448_v63 }
  0x43   :  { %475 = vmatpush1.msra.mxu0 %v2452_v0  ;;  %508 = vmatprep.mubr.f32.mxu0 %v3338_v18 }
  0x44   :  { %546 = vmatpush1.msra.mxu1 %v2456_v8  ;;  %579 = vmatprep.mubr.f32.mxu1 %v3338_v18 }
  0x45   :  { %509 = vmatmul.mubr.f32.vlgmr.msra.gmra.mxu0 %v46_v9  ;;  %580 = vmatmul.mubr.f32.vlgmr.msra.gmra.mxu1 %v46_v9  ;;  %v3339_v9 = vld [vmem:[#allocation29_spill] sm:$0xff] }
  0x46   :  { %616 = vmatprep.subr.mxu0 %v2219_v10  ;;  %687 = vmatprep.subr.mxu1 %v2221_v11 }
  0x47   :  { %617 = vmatpush1.msra.mxu0 %v2223_v12  ;;  %688 = vmatpush1.msra.mxu1 %v2225_v13 }
  0x48   :  { %618 = vmatprep.subr.mxu0 %v2229_v14  ;;  %689 = vmatprep.subr.mxu1 %v2231_v15 }
  0x49   :  { %619 = vmatpush1.msra.mxu0 %v2237_v16  ;;  %690 = vmatpush1.msra.mxu1 %v2239_v17 }
  0x4a   :  { %620 = vmatprep.subr.mxu0 %v2248_v19  ;;  %691 = vmatprep.subr.mxu1 %v2250_v20 }
  0x4b   :  { %621 = vmatpush1.msra.mxu0 %v2254_v21  ;;  %692 = vmatpush1.msra.mxu1 %v2256_v22 }
  0x4c   :  { %622 = vmatprep.subr.mxu0 %v2260_v23  ;;  %693 = vmatprep.subr.mxu1 %v2262_v24 }
  0x4d   :  { %623 = vmatpush1.msra.mxu0 %v2268_v25  ;;  %694 = vmatpush1.msra.mxu1 %v2270_v26 }
  0x4e   :  { %624 = vmatprep.subr.mxu0 %v2279_v28  ;;  %695 = vmatprep.subr.mxu1 %v2281_v29 }
  0x4f   :  { %625 = vmatpush1.msra.mxu0 %v2285_v30  ;;  %696 = vmatpush1.msra.mxu1 %v2287_v31 }
  0x50   :  { %626 = vmatprep.subr.mxu0 %v2291_v32  ;;  %697 = vmatprep.subr.mxu1 %v2293_v33 }
  0x51   :  { %627 = vmatpush1.msra.mxu0 %v2299_v34  ;;  %698 = vmatpush1.msra.mxu1 %v2301_v35 }
  0x52   :  { %628 = vmatprep.subr.mxu0 %v2310_v37  ;;  %699 = vmatprep.subr.mxu1 %v2312_v38 }
  0x53   :  { %629 = vmatpush1.msra.mxu0 %v2316_v39  ;;  %700 = vmatpush1.msra.mxu1 %v2318_v40 }
  0x54   :  { %630 = vmatprep.subr.mxu0 %v2322_v41  ;;  %701 = vmatprep.subr.mxu1 %v2324_v42 }
  0x55   :  { %631 = vmatpush1.msra.mxu0 %v2330_v43  ;;  %702 = vmatpush1.msra.mxu1 %v2332_v44 }
  0x56   :  { %632 = vmatprep.subr.mxu0 %v2341_v46  ;;  %703 = vmatprep.subr.mxu1 %v2343_v47 }
  0x57   :  { %633 = vmatpush1.msra.mxu0 %v2347_v48  ;;  %704 = vmatpush1.msra.mxu1 %v2349_v49 }
  0x58   :  { %634 = vmatprep.subr.mxu0 %v2353_v50  ;;  %705 = vmatprep.subr.mxu1 %v2355_v51 }
  0x59   :  { %635 = vmatpush1.msra.mxu0 %v2361_v52  ;;  %706 = vmatpush1.msra.mxu1 %v2363_v53 }
  0x5a   :  { %636 = vmatprep.subr.mxu0 %v2372_v55  ;;  %707 = vmatprep.subr.mxu1 %v2374_v56 }
  0x5b   :  { %637 = vmatpush1.msra.mxu0 %v2378_v57  ;;  %708 = vmatpush1.msra.mxu1 %v2380_v58 }
  0x5c   :  { %638 = vmatprep.subr.mxu0 %v2384_v59  ;;  %709 = vmatprep.subr.mxu1 %v2386_v60  ;;  %v3340_v60 = vld [vmem:[#allocation30_spill] sm:$0xff] }
  0x5d   :  { %639 = vmatpush1.msra.mxu0 %v2392_v61  ;;  %710 = vmatpush1.msra.mxu1 %v2394_v62 }
  0x5e   :  { %640 = vmatprep.subr.mxu0 %v2403_v1  ;;  %711 = vmatprep.subr.mxu1 %v2405_v2 }
  0x5f   :  { %641 = vmatpush1.msra.mxu0 %v2409_v3  ;;  %712 = vmatpush1.msra.mxu1 %v2411_v4 }
  0x60   :  { %642 = vmatprep.subr.mxu0 %v2415_v5  ;;  %713 = vmatprep.subr.mxu1 %v2417_v6 }
  0x61   :  { %643 = vmatpush1.msra.mxu0 %v2423_v7  ;;  %714 = vmatpush1.msra.mxu1 %v3339_v9 }
  0x62   :  { %644 = vmatprep.subr.mxu0 %v3340_v60  ;;  %715 = vmatprep.subr.mxu1 %v2436_v27  ;;  %v68_v27 = vlaneseq }
  0x63   :  { %645 = vmatpush1.msra.mxu0 %v2440_v36  ;;  %716 = vmatpush1.msra.mxu1 %v2442_v45 }
  0x64   :  { %646 = vmatprep.subr.mxu0 %v2446_v54  ;;  %717 = vmatprep.subr.mxu1 %v2448_v63  ;;  %v69_v36 = vshrl.u32 %v68_v27, 7 }
  0x65   :  { %647 = vmatpush1.msra.mxu0 %v2452_v0  ;;  %680 = vmatprep.mubr.f32.mxu0 %v3338_v18  ;;  %v66_v0 = vld [vmem:[%s3217_s5] sm:$0xf] }
  0x66   :  { %718 = vmatpush1.msra.mxu1 %v2456_v8  ;;  %751 = vmatprep.mubr.f32.mxu1 %v3338_v18  ;;  %v70_v54 = vsub.s32 0, %v69_v36  ;;  %v78_v63 = vsub.s32 2, %v69_v36  ;;  %v74_v18 = vsub.s32 1, %v69_v36 }
  0x67   :  { %789 = vmatprep.subr.mxu0 %v2219_v10  ;;  %860 = vmatprep.subr.mxu1 %v2221_v11  ;;  %v82_v10 = vsub.s32 3, %v69_v36 }
  0x68   :  { %v71_v7 = vrot.slane %v66_v0, %v70_v54  ;;  %v2546_v11 = vrot.slane %v66_v0, %v78_v63  ;;  %v75_v5 = vrot.slane %v66_v0, %v74_v18 }
  0x69   :  { %v2548_v4 = vrot.slane %v66_v0, %v82_v10 }
  0xd5   :  { %v2535_v60 = vpop.f32.mrf.mxu0  ;;  %v2537_v45 = vpop.f32.mrf.mxu1 }
  0xd7   :  { %v2542_v9 = vpop.f32.mrf.mxu0  ;;  %v2544_v8 = vpop.f32.mrf.mxu1 }
  0xdb   :  { %v185_v27 = vpop.f32.mrf.mxu0  ;;  %v298_v6 = vpop.f32.mrf.mxu1 }
  0xdc   :  { %v2550_v3 = vadd.f32 %v185_v27, %v71_v7  ;;  %v2553_v2 = vadd.f32 %v298_v6, %v2546_v11 }
  0xdd   :  { %v187_v1 = vpop.f32.mrf.mxu0  ;;  %v300_v62 = vpop.f32.mrf.mxu1 }
  0xde   :  { %3341 = vst [vmem:[#allocation38_spill] sm:$0xff] %v2550_v3  ;;  %3342 = vst [vmem:[#allocation39_spill] sm:$0xff] %v2553_v2  ;;  %v2555_v61 = vadd.f32 %v187_v1, %v75_v5  ;;  %v2558_v59 = vadd.f32 %v300_v62, %v2548_v4 }
  0xe0   :  { %3343 = vst [vmem:[#allocation40_spill] sm:$0xff] %v2555_v61  ;;  %3344 = vst [vmem:[#allocation41_spill] sm:$0xff] %v2558_v59 }
  0xe1   :  { %v191_v36 = vpop.f32.mrf.mxu0  ;;  %v304_v54 = vpop.f32.mrf.mxu1 }
  0xe2   :  { %v2560_v63 = vadd.f32 %v191_v36, %v71_v7  ;;  %v2563_v18 = vadd.f32 %v304_v54, %v2546_v11 }
  0xe3   :  { %v193_v0 = vpop.f32.mrf.mxu0  ;;  %v306_v10 = vpop.f32.mrf.mxu1 }
  0xe4   :  { %3345 = vst [vmem:[#allocation42_spill] sm:$0xff] %v2560_v63  ;;  %3346 = vst [vmem:[#allocation43_spill] sm:$0xff] %v2563_v18  ;;  %v2565_v27 = vadd.f32 %v193_v0, %v75_v5  ;;  %v2568_v6 = vadd.f32 %v306_v10, %v2548_v4 }
  0xe6   :  { %3347 = vst [vmem:[#allocation44_spill] sm:$0xff] %v2565_v27  ;;  %3348 = vst [vmem:[#allocation45_spill] sm:$0xff] %v2568_v6 }
  0xe7   :  { %v197_v2 = vpop.f32.mrf.mxu0  ;;  %v310_v1 = vpop.f32.mrf.mxu1 }
  0xe8   :  { %v2570_v61 = vadd.f32 %v197_v2, %v71_v7  ;;  %v2573_v62 = vadd.f32 %v310_v1, %v2546_v11 }
  0xe9   :  { %v199_v59 = vpop.f32.mrf.mxu0  ;;  %v312_v36 = vpop.f32.mrf.mxu1 }
  0xea   :  { %3349 = vst [vmem:[#allocation46_spill] sm:$0xff] %v2570_v61  ;;  %3350 = vst [vmem:[#allocation47_spill] sm:$0xff] %v2573_v62  ;;  %v2575_v63 = vadd.f32 %v199_v59, %v75_v5  ;;  %v2578_v54 = vadd.f32 %v312_v36, %v2548_v4 }
  0xec   :  { %3351 = vst [vmem:[#allocation48_spill] sm:$0xff] %v2575_v63  ;;  %3352 = vst [vmem:[#allocation49_spill] sm:$0xff] %v2578_v54 }
  0xed   :  { %v203_v18 = vpop.f32.mrf.mxu0  ;;  %v316_v0 = vpop.f32.mrf.mxu1 }
  0xee   :  { %v2580_v27 = vadd.f32 %v203_v18, %v71_v7  ;;  %v2583_v10 = vadd.f32 %v316_v0, %v2546_v11 }
  0xef   :  { %v205_v6 = vpop.f32.mrf.mxu0  ;;  %v318_v2 = vpop.f32.mrf.mxu1 }
  0xf0   :  { %3353 = vst [vmem:[#allocation50_spill] sm:$0xff] %v2580_v27  ;;  %3354 = vst [vmem:[#allocation51_spill] sm:$0xff] %v2583_v10  ;;  %v2585_v61 = vadd.f32 %v205_v6, %v75_v5  ;;  %v2588_v1 = vadd.f32 %v318_v2, %v2548_v4 }
  0xf2   :  { %3355 = vst [vmem:[#allocation52_spill] sm:$0xff] %v2585_v61  ;;  %3356 = vst [vmem:[#allocation53_spill] sm:$0xff] %v2588_v1 }
  0xf3   :  { %v209_v62 = vpop.f32.mrf.mxu0  ;;  %v322_v59 = vpop.f32.mrf.mxu1 }
  0xf4   :  { %v2590_v63 = vadd.f32 %v209_v62, %v71_v7  ;;  %v2593_v36 = vadd.f32 %v322_v59, %v2546_v11 }
  0xf5   :  { %v211_v54 = vpop.f32.mrf.mxu0  ;;  %v324_v18 = vpop.f32.mrf.mxu1 }
  0xf6   :  { %3357 = vst [vmem:[#allocation54_spill] sm:$0xff] %v2590_v63  ;;  %3358 = vst [vmem:[#allocation55_spill] sm:$0xff] %v2593_v36  ;;  %v2595_v27 = vadd.f32 %v211_v54, %v75_v5  ;;  %v2598_v0 = vadd.f32 %v324_v18, %v2548_v4 }
  0xf8   :  { %3359 = vst [vmem:[#allocation56_spill] sm:$0xff] %v2595_v27  ;;  %3360 = vst [vmem:[#allocation57_spill] sm:$0xff] %v2598_v0 }
  0xf9   :  { %v215_v10 = vpop.f32.mrf.mxu0  ;;  %v328_v6 = vpop.f32.mrf.mxu1 }
  0xfa   :  { %v2600_v61 = vadd.f32 %v215_v10, %v71_v7  ;;  %v2603_v2 = vadd.f32 %v328_v6, %v2546_v11 }
  0xfb   :  { %v217_v1 = vpop.f32.mrf.mxu0  ;;  %v330_v62 = vpop.f32.mrf.mxu1 }
  0xfc   :  { %3361 = vst [vmem:[#allocation58_spill] sm:$0xff] %v2600_v61  ;;  %3362 = vst [vmem:[#allocation59_spill] sm:$0xff] %v2603_v2  ;;  %v2605_v63 = vadd.f32 %v217_v1, %v75_v5  ;;  %v2608_v59 = vadd.f32 %v330_v62, %v2548_v4  ;;  %v180_v1 = vadd.f32 %v2535_v60, %v71_v7 }
  0xfd   :  { %v182_v62 = vadd.f32 %v2542_v9, %v75_v5 }
  0xfe   :  { %3363 = vst [vmem:[#allocation60_spill] sm:$0xff] %v2605_v63  ;;  %3364 = vst [vmem:[#allocation61_spill] sm:$0xff] %v2608_v59 }
  0xff   :  { %v221_v36 = vpop.f32.mrf.mxu0  ;;  %v334_v54 = vpop.f32.mrf.mxu1 }
 0x100   :  { %v2610_v27 = vadd.f32 %v221_v36, %v71_v7  ;;  %v2613_v18 = vadd.f32 %v334_v54, %v2546_v11  ;;  %v295_v54 = vadd.f32 %v2544_v8, %v2548_v4 }
 0x101   :  { %v223_v0 = vpop.f32.mrf.mxu0  ;;  %v336_v10 = vpop.f32.mrf.mxu1 }
 0x102   :  { %3365 = vst [vmem:[#allocation62_spill] sm:$0xff] %v2610_v27  ;;  %3366 = vst [vmem:[#allocation63_spill] sm:$0xff] %v2613_v18  ;;  %v2615_v61 = vadd.f32 %v223_v0, %v75_v5  ;;  %v2618_v6 = vadd.f32 %v336_v10, %v2548_v4  ;;  %v293_v10 = vadd.f32 %v2537_v45, %v2546_v11  ;;  %v48_v4 = vld [vmem:[%s3214_s2] sm:$0xff]  ;;  %s2137_s2 = smov [#allocation9]  }
 0x103   :  { %s1845_s22 = sshll.u32 %s2137_s2, 4  ;;  %s1846_s22 = int_to_ptr.vmem [resolvable:$true] %s1845_s22 }
 0x104   :  { %3367 = vst [vmem:[#allocation64_spill] sm:$0xff] %v2615_v61  ;;  %3368 = vst [vmem:[#allocation65_spill] sm:$0xff] %v2618_v6  ;;  %v3390_v61 = vld [vmem:[#allocation37_spill] sm:$0xff]  ;;  %s2067_s27 = scalar_lea.vmem %s1846_s22, 128  ;;  %p2072_p6 = scmp.lt.s32.totalorder %s1846_s22, %s1846_s22 }
 0x105   :  { %v510_v2 = vpop.f32.mrf.mxu0  ;;  %v581_v63 = vpop.f32.mrf.mxu1  ;;  %p2068_p5 = scmp.ne.s32.totalorder %s1846_s22, %s2067_s27  ;;  %p2073_p7 = scmp.lt.s32.totalorder %s2067_s27, %s2067_s27 }
 0x106   :  { %v586_v59 = vadd.f32 %v510_v2, %v180_v1  ;;  %v588_v60 = vadd.f32 %v581_v63, %v293_v10  ;;  %v3373_v10 = vld [vmem:[#allocation21_spill] sm:$0xff] }
 0x107   :  { %v512_v3 = vpop.f32.mrf.mxu0  ;;  %v583_v58 = vpop.f32.mrf.mxu1  ;;  %p2074_p8 = por %p2073_p7, %p2072_p6 }
 0x108   :  { %v590_v36 = vmul.f32 0.5, %v586_v59  ;;  %v587_v27 = vadd.f32 %v512_v3, %v182_v62  ;;  %v589_v18 = vadd.f32 %v583_v58, %v295_v54  ;;  %v592_v7 = vmul.f32 0.5, %v588_v60  ;;  %v3369_v62 = vld [vmem:[#allocation17_spill] sm:$0xff]  ;;  %v3371_v54 = vld [vmem:[#allocation19_spill] sm:$0xff]  ;;  %v3374_v60 = vld [vmem:[#allocation22_spill] sm:$0xff] }
 0x109   :  { %p2075_p9 = pnand %p2074_p8, %p2068_p5 }
 0x10a   :  { %1903 = vtanh.f32 %v590_v36  ;;  %v591_v0 = vmul.f32 0.5, %v587_v27  ;;  %v3370_v36 = vld [vmem:[#allocation18_spill] sm:$0xff] }
 0x10c   :  { %1905 = vtanh.f32 %v591_v0  ;;  %v3372_v0 = vld [vmem:[#allocation20_spill] sm:$0xff] }
 0x10d   :  { %1907 = vtanh.f32 %v589_v18 }
 0x10e   :  { %1909 = vtanh.f32 %v592_v7  ;;  %v3375_v7 = vld [vmem:[#allocation23_spill] sm:$0xff] }
 0x117   :  { %v1904_v6 = vpop.eup %1903 }
 0x118   :  { %v596_v5 = vmul.f32 0.5, %v1904_v6 }
 0x119   :  { %v1906_v9 = vpop.eup %1905 }
 0x11a   :  { %v599_v2 = vadd.f32 0.5, %v596_v5  ;;  %v597_v3 = vmul.f32 0.5, %v1906_v9  ;;  %v1908_v27 = vpop.eup %1907  ;;  %v3376_v5 = vld [vmem:[#allocation24_spill] sm:$0xff]  ;;  %v3377_v9 = vld [vmem:[#allocation25_spill] sm:$0xff] }
 0x11b   :  { %v1910_v11 = vpop.eup %1909 }
 0x11c   :  { %v600_v8 = vadd.f32 0.5, %v597_v3  ;;  %v604_v58 = vmul.f32 %v1908_v27, %v599_v2  ;;  %v598_v45 = vmul.f32 0.5, %v1910_v11  ;;  %v3378_v2 = vld [vmem:[#allocation26_spill] sm:$0xff]  ;;  %v3379_v3 = vld [vmem:[#allocation27_spill] sm:$0xff]  ;;  %v3385_v11 = vld [vmem:[#allocation33_spill] sm:$0xff] }
 0x11d   :  { %v3382_v27 = vld [vmem:[#allocation30_spill] sm:$0xff] }
 0x11e   :  { %v603_v59 = vmul.f32 %v600_v8, %v48_v4  ;;  %v601_v63 = vadd.f32 0.5, %v598_v45  ;;  %v3380_v4 = vld [vmem:[#allocation28_spill] sm:$0xff]  ;;  %v3381_v8 = vld [vmem:[#allocation29_spill] sm:$0xff]  ;;  %v3386_v45 = vld [vmem:[#allocation34_spill] sm:$0xff] }
 0x120   :  { %v2629_v1 = vadd.f32 %v604_v58, %v603_v59  ;;  %v3383_v59 = vld [vmem:[#allocation31_spill] sm:$0xff]  ;;  %v3384_v58 = vld [vmem:[#allocation32_spill] sm:$0xff] }
 0x122   :  { %1911 = vtanh.f32 %v2629_v1 }
 0x12f   :  { %v1912_v18 = vpop.eup %1911 }
 0x130   :  { %v607_v6 = vmul.f32 %v1912_v18, %v601_v63  ;;  %v3387_v63 = vld [vmem:[#allocation35_spill] sm:$0xff]  ;;  %v3388_v18 = vld [vmem:[#allocation36_spill] sm:$0xff] }
 0x132   :  { %608 = vst [vmem:[#allocation8] sm:$0xff] %v607_v6  ;;  %681 = vmatmul.mubr.f32.vlgmr.msra.gmra.mxu0 %v607_v6  ;;  %752 = vmatmul.mubr.f32.vlgmr.msra.gmra.mxu1 %v607_v6  ;;  %v3389_v6 = vmov 0.0  }
 0x133   :  { %790 = vmatpush1.msra.mxu0 %v2223_v12  ;;  %861 = vmatpush1.msra.mxu1 %v2225_v13 }
 0x134   :  { %791 = vmatprep.subr.mxu0 %v2229_v14  ;;  %862 = vmatprep.subr.mxu1 %v2231_v15 }
 0x135   :  { %792 = vmatpush1.msra.mxu0 %v2237_v16  ;;  %863 = vmatpush1.msra.mxu1 %v2239_v17 }
 0x136   :  { %793 = vmatprep.subr.mxu0 %v2248_v19  ;;  %864 = vmatprep.subr.mxu1 %v2250_v20 }
 0x137   :  { %794 = vmatpush1.msra.mxu0 %v2254_v21  ;;  %865 = vmatpush1.msra.mxu1 %v2256_v22 }
 0x138   :  { %795 = vmatprep.subr.mxu0 %v2260_v23  ;;  %866 = vmatprep.subr.mxu1 %v2262_v24 }
 0x139   :  { %796 = vmatpush1.msra.mxu0 %v2268_v25  ;;  %867 = vmatpush1.msra.mxu1 %v2270_v26 }
 0x13a   :  { %797 = vmatprep.subr.mxu0 %v2279_v28  ;;  %868 = vmatprep.subr.mxu1 %v2281_v29 }
 0x13b   :  { %798 = vmatpush1.msra.mxu0 %v2285_v30  ;;  %869 = vmatpush1.msra.mxu1 %v2287_v31 }
 0x13c   :  { %799 = vmatprep.subr.mxu0 %v2291_v32  ;;  %870 = vmatprep.subr.mxu1 %v2293_v33 }
 0x13d   :  { %800 = vmatpush1.msra.mxu0 %v2299_v34  ;;  %871 = vmatpush1.msra.mxu1 %v2301_v35 }
 0x13e   :  { %801 = vmatprep.subr.mxu0 %v2310_v37  ;;  %872 = vmatprep.subr.mxu1 %v2312_v38 }
 0x13f   :  { %802 = vmatpush1.msra.mxu0 %v2316_v39  ;;  %873 = vmatpush1.msra.mxu1 %v2318_v40 }
 0x140   :  { %803 = vmatprep.subr.mxu0 %v2322_v41  ;;  %874 = vmatprep.subr.mxu1 %v2324_v42 }
 0x141   :  { %804 = vmatpush1.msra.mxu0 %v2330_v43  ;;  %875 = vmatpush1.msra.mxu1 %v2332_v44 }
 0x142   :  { %805 = vmatprep.subr.mxu0 %v2341_v46  ;;  %876 = vmatprep.subr.mxu1 %v2343_v47 }
 0x143   :  { %806 = vmatpush1.msra.mxu0 %v2347_v48  ;;  %877 = vmatpush1.msra.mxu1 %v2349_v49 }
 0x144   :  { %807 = vmatprep.subr.mxu0 %v2353_v50  ;;  %878 = vmatprep.subr.mxu1 %v2355_v51 }
 0x145   :  { %808 = vmatpush1.msra.mxu0 %v2361_v52  ;;  %879 = vmatpush1.msra.mxu1 %v2363_v53 }
 0x146   :  { %809 = vmatprep.subr.mxu0 %v2372_v55  ;;  %880 = vmatprep.subr.mxu1 %v2374_v56 }
 0x147   :  { %810 = vmatpush1.msra.mxu0 %v2378_v57  ;;  %881 = vmatpush1.msra.mxu1 %v3369_v62 }
 0x148   :  { %811 = vmatprep.subr.mxu0 %v3370_v36  ;;  %882 = vmatprep.subr.mxu1 %v3371_v54 }
 0x149   :  { %812 = vmatpush1.msra.mxu0 %v3372_v0  ;;  %883 = vmatpush1.msra.mxu1 %v3373_v10 }
 0x14a   :  { %813 = vmatprep.subr.mxu0 %v3374_v60  ;;  %884 = vmatprep.subr.mxu1 %v3375_v7 }
 0x14b   :  { %814 = vmatpush1.msra.mxu0 %v3376_v5  ;;  %885 = vmatpush1.msra.mxu1 %v3377_v9  ;;  %v3395_v5 = vld [vmem:[#allocation41_spill] sm:$0xff] }
 0x14c   :  { %815 = vmatprep.subr.mxu0 %v3378_v2  ;;  %886 = vmatprep.subr.mxu1 %v3379_v3 }
 0x14d   :  { %816 = vmatpush1.msra.mxu0 %v3380_v4  ;;  %887 = vmatpush1.msra.mxu1 %v3381_v8  ;;  %v3391_v8 = vld [vmem:[#allocation15_spill] sm:$0xff]  ;;  %v3393_v4 = vld [vmem:[#allocation38_spill] sm:$0xff] }
 0x14e   :  { %817 = vmatprep.subr.mxu0 %v3382_v27  ;;  %888 = vmatprep.subr.mxu1 %v3383_v59  ;;  %v3392_v27 = vld [vmem:[#allocation16_spill] sm:$0xff] }
 0x14f   :  { %818 = vmatpush1.msra.mxu0 %v3384_v58  ;;  %889 = vmatpush1.msra.mxu1 %v3385_v11 }
 0x150   :  { %819 = vmatprep.subr.mxu0 %v3386_v45  ;;  %890 = vmatprep.subr.mxu1 %v3387_v63  ;;  %v3394_v63 = vld [vmem:[#allocation40_spill] sm:$0xff] }
 0x151   :  { %820 = vmatpush1.msra.mxu0 %v3388_v18  ;;  %853 = vmatprep.mubr.f32.mxu0 %v3389_v6 }
 0x152   :  { %891 = vmatpush1.msra.mxu1 %v3390_v61  ;;  %924 = vmatprep.mubr.f32.mxu1 %v3389_v6  ;;  %v3396_v61 = vld [vmem:[#allocation39_spill] sm:$0xff] }
 0x153   :  { %962 = vmatprep.subr.mxu0 %v3391_v8  ;;  %1033 = vmatprep.subr.mxu1 %v3392_v27 }
 0x1f2   :  { %v682_v59 = vpop.f32.mrf.mxu0  ;;  %v753_v58 = vpop.f32.mrf.mxu1 }
 0x1f3   :  { %v758_v11 = vadd.f32 %v682_v59, %v3393_v4  ;;  %v760_v6 = vadd.f32 %v753_v58, %v3396_v61 }
 0x1f4   :  { %v684_v3 = vpop.f32.mrf.mxu0  ;;  %v755_v45 = vpop.f32.mrf.mxu1 }
 0x1f5   :  { %v762_v2 = vmul.f32 0.5, %v758_v11  ;;  %v759_v9 = vadd.f32 %v684_v3, %v3394_v63  ;;  %v761_v7 = vadd.f32 %v755_v45, %v3395_v5  ;;  %v764_v8 = vmul.f32 0.5, %v760_v6 }
 0x1f7   :  { %1913 = vtanh.f32 %v762_v2  ;;  %v763_v18 = vmul.f32 0.5, %v759_v9 }
 0x1f9   :  { %1915 = vtanh.f32 %v763_v18  ;;  %v3420_v18 = vld [vmem:[#allocation44_spill] sm:$0xff] }
 0x1fa   :  { %1917 = vtanh.f32 %v761_v7 }
 0x1fb   :  { %1919 = vtanh.f32 %v764_v8 }
 0x204   :  { %v1914_v60 = vpop.eup %1913 }
 0x205   :  { %v768_v27 = vmul.f32 0.5, %v1914_v60 }
 0x206   :  { %v1916_v10 = vpop.eup %1915 }
 0x207   :  { %v771_v0 = vadd.f32 0.5, %v768_v27  ;;  %v769_v4 = vmul.f32 0.5, %v1916_v10  ;;  %v1918_v59 = vpop.eup %1917  ;;  %v3421_v27 = vld [vmem:[#allocation45_spill] sm:$0xff] }
 0x208   :  { %v1920_v5 = vpop.eup %1919 }
 0x209   :  { %v772_v54 = vadd.f32 0.5, %v769_v4  ;;  %v776_v11 = vmul.f32 %v1918_v59, %v771_v0  ;;  %v770_v7 = vmul.f32 0.5, %v1920_v5  ;;  %v3419_v0 = vld [vmem:[#allocation42_spill] sm:$0xff]  ;;  %v3422_v59 = vld [vmem:[#allocation43_spill] sm:$0xff] }
 0x20b   :  { %v775_v3 = vmul.f32 %v772_v54, %v2629_v1  ;;  %v773_v9 = vadd.f32 0.5, %v770_v7 }
 0x20d   :  { %v2703_v2 = vadd.f32 %v776_v11, %v775_v3 }
 0x20f   :  { %1921 = vtanh.f32 %v2703_v2 }
 0x21c   :  { %v1922_v61 = vpop.eup %1921 }
 0x21d   :  { %v779_v58 = vmul.f32 %v1922_v61, %v773_v9 }
 0x21f   :  { %781 = vst [vmem:[#allocation8 + $0x8] sm:$0xff] %v779_v58  ;;  %854 = vmatmul.mubr.f32.vlgmr.msra.gmra.mxu0 %v779_v58  ;;  %925 = vmatmul.mubr.f32.vlgmr.msra.gmra.mxu1 %v779_v58 }
 0x220   :  { %963 = vmatpush1.msra.mxu0 %v2223_v12  ;;  %1034 = vmatpush1.msra.mxu1 %v2225_v13  ;;  %v3397_v12 = vld [vmem:[#allocation19_spill] sm:$0xff]  ;;  %v3398_v13 = vld [vmem:[#allocation20_spill] sm:$0xff] }
 0x221   :  { %964 = vmatprep.subr.mxu0 %v2229_v14  ;;  %1035 = vmatprep.subr.mxu1 %v2231_v15  ;;  %v3399_v14 = vld [vmem:[#allocation21_spill] sm:$0xff]  ;;  %v3400_v15 = vld [vmem:[#allocation22_spill] sm:$0xff] }
 0x222   :  { %965 = vmatpush1.msra.mxu0 %v2237_v16  ;;  %1036 = vmatpush1.msra.mxu1 %v2239_v17  ;;  %v3401_v16 = vld [vmem:[#allocation23_spill] sm:$0xff]  ;;  %v3402_v17 = vld [vmem:[#allocation24_spill] sm:$0xff] }
 0x223   :  { %966 = vmatprep.subr.mxu0 %v2248_v19  ;;  %1037 = vmatprep.subr.mxu1 %v2250_v20  ;;  %v3403_v19 = vld [vmem:[#allocation25_spill] sm:$0xff]  ;;  %v3404_v20 = vld [vmem:[#allocation26_spill] sm:$0xff] }
 0x224   :  { %967 = vmatpush1.msra.mxu0 %v2254_v21  ;;  %1038 = vmatpush1.msra.mxu1 %v2256_v22  ;;  %v3405_v21 = vld [vmem:[#allocation27_spill] sm:$0xff]  ;;  %v3406_v22 = vld [vmem:[#allocation28_spill] sm:$0xff] }
 0x225   :  { %968 = vmatprep.subr.mxu0 %v2260_v23  ;;  %1039 = vmatprep.subr.mxu1 %v2262_v24  ;;  %v3407_v23 = vld [vmem:[#allocation29_spill] sm:$0xff]  ;;  %v3408_v24 = vld [vmem:[#allocation30_spill] sm:$0xff] }
 0x226   :  { %969 = vmatpush1.msra.mxu0 %v2268_v25  ;;  %1040 = vmatpush1.msra.mxu1 %v2270_v26  ;;  %v3409_v25 = vld [vmem:[#allocation31_spill] sm:$0xff]  ;;  %v3410_v26 = vld [vmem:[#allocation32_spill] sm:$0xff] }
 0x227   :  { %970 = vmatprep.subr.mxu0 %v2279_v28  ;;  %1041 = vmatprep.subr.mxu1 %v2281_v29  ;;  %v3411_v28 = vld [vmem:[#allocation33_spill] sm:$0xff]  ;;  %v3412_v29 = vld [vmem:[#allocation34_spill] sm:$0xff] }
 0x228   :  { %971 = vmatpush1.msra.mxu0 %v2285_v30  ;;  %1042 = vmatpush1.msra.mxu1 %v2287_v31  ;;  %v3413_v30 = vld [vmem:[#allocation35_spill] sm:$0xff]  ;;  %v3414_v31 = vld [vmem:[#allocation36_spill] sm:$0xff] }
 0x229   :  { %972 = vmatprep.subr.mxu0 %v2291_v32  ;;  %1043 = vmatprep.subr.mxu1 %v2293_v33  ;;  %v3415_v32 = vmov 0.0   ;;  %v3416_v33 = vld [vmem:[#allocation37_spill] sm:$0xff] }
 0x22a   :  { %973 = vmatpush1.msra.mxu0 %v2299_v34  ;;  %1044 = vmatpush1.msra.mxu1 %v2301_v35  ;;  %v2770_v34 = vld [vmem:[#allocation5 + $0x1e8] sm:$0xff]  ;;  %v2773_v35 = vld [vmem:[#allocation5 + $0x1f8] sm:$0xff] }
 0x22b   :  { %974 = vmatprep.subr.mxu0 %v2310_v37  ;;  %1045 = vmatprep.subr.mxu1 %v2312_v38  ;;  %3417 = vst [vmem:[#allocation17_spill] sm:$0xff] %v2770_v34  ;;  %3418 = vst [vmem:[#allocation18_spill] sm:$0xff] %v2773_v35 }
 0x22c   :  { %975 = vmatpush1.msra.mxu0 %v2316_v39  ;;  %1046 = vmatpush1.msra.mxu1 %v2318_v40 }
 0x22d   :  { %976 = vmatprep.subr.mxu0 %v2322_v41  ;;  %1047 = vmatprep.subr.mxu1 %v2324_v42 }
 0x22e   :  { %977 = vmatpush1.msra.mxu0 %v2330_v43  ;;  %1048 = vmatpush1.msra.mxu1 %v2332_v44 }
 0x22f   :  { %978 = vmatprep.subr.mxu0 %v2341_v46  ;;  %1049 = vmatprep.subr.mxu1 %v2343_v47 }
 0x230   :  { %979 = vmatpush1.msra.mxu0 %v2347_v48  ;;  %1050 = vmatpush1.msra.mxu1 %v2349_v49 }
 0x231   :  { %980 = vmatprep.subr.mxu0 %v2353_v50  ;;  %1051 = vmatprep.subr.mxu1 %v2355_v51 }
 0x232   :  { %981 = vmatpush1.msra.mxu0 %v2361_v52  ;;  %1052 = vmatpush1.msra.mxu1 %v2363_v53 }
 0x233   :  { %982 = vmatprep.subr.mxu0 %v2372_v55  ;;  %1053 = vmatprep.subr.mxu1 %v2374_v56 }
 0x234   :  { %983 = vmatpush1.msra.mxu0 %v2378_v57  ;;  %1054 = vmatpush1.msra.mxu1 %v3369_v62 }
 0x235   :  { %984 = vmatprep.subr.mxu0 %v3370_v36  ;;  %1055 = vmatprep.subr.mxu1 %v3397_v12 }
 0x236   :  { %985 = vmatpush1.msra.mxu0 %v3398_v13  ;;  %1056 = vmatpush1.msra.mxu1 %v3399_v14 }
 0x237   :  { %986 = vmatprep.subr.mxu0 %v3400_v15  ;;  %1057 = vmatprep.subr.mxu1 %v3401_v16 }
 0x238   :  { %987 = vmatpush1.msra.mxu0 %v3402_v17  ;;  %1058 = vmatpush1.msra.mxu1 %v3403_v19 }
 0x239   :  { %988 = vmatprep.subr.mxu0 %v3404_v20  ;;  %1059 = vmatprep.subr.mxu1 %v3405_v21 }
 0x23a   :  { %989 = vmatpush1.msra.mxu0 %v3406_v22  ;;  %1060 = vmatpush1.msra.mxu1 %v3407_v23 }
 0x23b   :  { %990 = vmatprep.subr.mxu0 %v3408_v24  ;;  %1061 = vmatprep.subr.mxu1 %v3409_v25 }
 0x23c   :  { %991 = vmatpush1.msra.mxu0 %v3410_v26  ;;  %1062 = vmatpush1.msra.mxu1 %v3411_v28 }
 0x23d   :  { %992 = vmatprep.subr.mxu0 %v3412_v29  ;;  %1063 = vmatprep.subr.mxu1 %v3413_v30 }
 0x23e   :  { %993 = vmatpush1.msra.mxu0 %v3414_v31  ;;  %1026 = vmatprep.mubr.f32.mxu0 %v3415_v32 }
 0x23f   :  { %1064 = vmatpush1.msra.mxu1 %v3416_v33  ;;  %1097 = vmatprep.mubr.f32.mxu1 %v3415_v32 }
 0x240   :  { %1135 = vmatprep.subr.mxu0 %v2770_v34  ;;  %1206 = vmatprep.subr.mxu1 %v2773_v35 }
 0x2df   :  { %v855_v1 = vpop.f32.mrf.mxu0  ;;  %v926_v54 = vpop.f32.mrf.mxu1 }
 0x2e0   :  { %v931_v10 = vadd.f32 %v855_v1, %v3419_v0  ;;  %v933_v11 = vadd.f32 %v926_v54, %v3422_v59  ;;  %v2793_v59 = vld [vmem:[#allocation5 + $0x1d8] sm:$0xff] }
 0x2e1   :  { %v857_v60 = vpop.f32.mrf.mxu0  ;;  %v928_v45 = vpop.f32.mrf.mxu1 }
 0x2e2   :  { %v935_v63 = vmul.f32 0.5, %v931_v10  ;;  %v932_v6 = vadd.f32 %v857_v60, %v3420_v18  ;;  %v934_v4 = vadd.f32 %v928_v45, %v3421_v27  ;;  %v937_v3 = vmul.f32 0.5, %v933_v11  ;;  %v2784_v27 = vld [vmem:[#allocation5 + $0x1e0] sm:$0xff] }
 0x2e3   :  { %v2796_v11 = vld [vmem:[#allocation5 + $0x1c0] sm:$0xff] }
 0x2e4   :  { %1923 = vtanh.f32 %v935_v63  ;;  %v936_v8 = vmul.f32 0.5, %v932_v6 }
 0x2e6   :  { %1925 = vtanh.f32 %v936_v8 }
 0x2e7   :  { %1927 = vtanh.f32 %v934_v4  ;;  %v2787_v4 = vld [vmem:[#allocation5 + $0x1f0] sm:$0xff] }
 0x2e8   :  { %1929 = vtanh.f32 %v937_v3  ;;  %v2799_v3 = vld [vmem:[#allocation5 + $0x1d0] sm:$0xff] }
 0x2f1   :  { %v1924_v5 = vpop.eup %1923 }
 0x2f2   :  { %v941_v7 = vmul.f32 0.5, %v1924_v5  ;;  %v2802_v5 = vld [vmem:[#allocation5 + $0x1a8] sm:$0xff] }
 0x2f3   :  { %v1926_v9 = vpop.eup %1925 }
 0x2f4   :  { %v944_v61 = vadd.f32 0.5, %v941_v7  ;;  %v942_v58 = vmul.f32 0.5, %v1926_v9  ;;  %v1928_v1 = vpop.eup %1927  ;;  %v2805_v7 = vld [vmem:[#allocation5 + $0x1b8] sm:$0xff]  ;;  %v2808_v9 = vld [vmem:[#allocation5 + $0x1a0] sm:$0xff] }
 0x2f5   :  { %v1930_v45 = vpop.eup %1929 }
 0x2f6   :  { %v945_v0 = vadd.f32 0.5, %v942_v58  ;;  %v949_v10 = vmul.f32 %v1928_v1, %v944_v61  ;;  %v943_v18 = vmul.f32 0.5, %v1930_v45  ;;  %v2811_v61 = vld [vmem:[#allocation5 + $0x1b0] sm:$0xff]  ;;  %v2814_v58 = vld [vmem:[#allocation5 + $0x188] sm:$0xff]  ;;  %v2817_v1 = vld [vmem:[#allocation5 + $0x198] sm:$0xff] }
 0x2f7   :  { %v2829_v45 = vld [vmem:[#allocation5 + $0x178] sm:$0xff] }
 0x2f8   :  { %v948_v60 = vmul.f32 %v945_v0, %v2703_v2  ;;  %v946_v6 = vadd.f32 0.5, %v943_v18  ;;  %v2790_v2 = vld [vmem:[#allocation5 + $0x1c8] sm:$0xff]  ;;  %v2820_v0 = vld [vmem:[#allocation5 + $0x180] sm:$0xff]  ;;  %3424 = vst [vmem:[#allocation16_spill] sm:$0xff] %v2829_v45 }
 0x2f9   :  { %v2832_v18 = vld [vmem:[#allocation5 + $0x160] sm:$0xff] }
 0x2fa   :  { %v2781_v63 = vadd.f32 %v949_v10, %v948_v60  ;;  %v2823_v10 = vld [vmem:[#allocation5 + $0x190] sm:$0xff]  ;;  %v2826_v60 = vld [vmem:[#allocation5 + $0x168] sm:$0xff] }
 0x2fb   :  { %3423 = vst [vmem:[#allocation15_spill] sm:$0xff] %v2826_v60 }
 0x2fc   :  { %1931 = vtanh.f32 %v2781_v63 }
 0x309   :  { %v1932_v54 = vpop.eup %1931 }
 0x30a   :  { %v952_v8 = vmul.f32 %v1932_v54, %v946_v6  ;;  %v2835_v6 = vld [vmem:[#allocation5 + $0x170] sm:$0xff]  ;;  %v2838_v54 = vld [vmem:[#allocation5 + $0x148] sm:$0xff] }
 0x30c   :  { %954 = vst [vmem:[#allocation8 + $0x10] sm:$0xff] %v952_v8  ;;  %1027 = vmatmul.mubr.f32.vlgmr.msra.gmra.mxu0 %v952_v8  ;;  %1098 = vmatmul.mubr.f32.vlgmr.msra.gmra.mxu1 %v952_v8  ;;  %v2841_v8 = vld [vmem:[#allocation5 + $0x158] sm:$0xff] }
 0x30d   :  { %1136 = vmatpush1.msra.mxu0 %v2784_v27  ;;  %1207 = vmatpush1.msra.mxu1 %v2787_v4 }
 0x30e   :  { %1137 = vmatprep.subr.mxu0 %v2790_v2  ;;  %1208 = vmatprep.subr.mxu1 %v2793_v59 }
 0x30f   :  { %1138 = vmatpush1.msra.mxu0 %v2796_v11  ;;  %1209 = vmatpush1.msra.mxu1 %v2799_v3 }
 0x310   :  { %1139 = vmatprep.subr.mxu0 %v2802_v5  ;;  %1210 = vmatprep.subr.mxu1 %v2805_v7 }
 0x311   :  { %1140 = vmatpush1.msra.mxu0 %v2808_v9  ;;  %1211 = vmatpush1.msra.mxu1 %v2811_v61 }
 0x312   :  { %1141 = vmatprep.subr.mxu0 %v2814_v58  ;;  %1212 = vmatprep.subr.mxu1 %v2817_v1 }
 0x313   :  { %1142 = vmatpush1.msra.mxu0 %v2820_v0  ;;  %1213 = vmatpush1.msra.mxu1 %v2823_v10 }
 0x314   :  { %1143 = vmatprep.subr.mxu0 %v2826_v60  ;;  %1214 = vmatprep.subr.mxu1 %v2829_v45  ;;  %v2844_v60 = vld [vmem:[#allocation5 + $0x140] sm:$0xff]  ;;  %v2847_v45 = vld [vmem:[#allocation5 + $0x150] sm:$0xff] }
 0x315   :  { %1144 = vmatpush1.msra.mxu0 %v2832_v18  ;;  %1215 = vmatpush1.msra.mxu1 %v2835_v6 }
 0x316   :  { %1145 = vmatprep.subr.mxu0 %v2838_v54  ;;  %1216 = vmatprep.subr.mxu1 %v2841_v8 }
 0x317   :  { %1146 = vmatpush1.msra.mxu0 %v2844_v60  ;;  %1217 = vmatpush1.msra.mxu1 %v2847_v45 }
 0x318   :  { %1147 = vmatprep.subr.mxu0 %v2310_v37  ;;  %1218 = vmatprep.subr.mxu1 %v2312_v38 }
 0x319   :  { %1148 = vmatpush1.msra.mxu0 %v2316_v39  ;;  %1219 = vmatpush1.msra.mxu1 %v2318_v40  ;;  %v3425_v39 = vld [vmem:[#allocation46_spill] sm:$0xff] }
 0x31a   :  { %1149 = vmatprep.subr.mxu0 %v2322_v41  ;;  %1220 = vmatprep.subr.mxu1 %v2324_v42 }
 0x31b   :  { %1150 = vmatpush1.msra.mxu0 %v2330_v43  ;;  %1221 = vmatpush1.msra.mxu1 %v2332_v44  ;;  %v3426_v44 = vld [vmem:[#allocation48_spill] sm:$0xff] }
 0x31c   :  { %1151 = vmatprep.subr.mxu0 %v2341_v46  ;;  %1222 = vmatprep.subr.mxu1 %v2343_v47 }
 0x31d   :  { %1152 = vmatpush1.msra.mxu0 %v2347_v48  ;;  %1223 = vmatpush1.msra.mxu1 %v2349_v49  ;;  %v3427_v48 = vld [vmem:[#allocation49_spill] sm:$0xff] }
 0x31e   :  { %1153 = vmatprep.subr.mxu0 %v2353_v50  ;;  %1224 = vmatprep.subr.mxu1 %v2355_v51  ;;  %v3428_v50 = vld [vmem:[#allocation47_spill] sm:$0xff] }
 0x31f   :  { %1154 = vmatpush1.msra.mxu0 %v2361_v52  ;;  %1225 = vmatpush1.msra.mxu1 %v2363_v53 }
 0x320   :  { %1155 = vmatprep.subr.mxu0 %v2372_v55  ;;  %1226 = vmatprep.subr.mxu1 %v2374_v56 }
 0x321   :  { %1156 = vmatpush1.msra.mxu0 %v2378_v57  ;;  %1227 = vmatpush1.msra.mxu1 %v3369_v62 }
 0x322   :  { %1157 = vmatprep.subr.mxu0 %v3370_v36  ;;  %1228 = vmatprep.subr.mxu1 %v3397_v12 }
 0x323   :  { %1158 = vmatpush1.msra.mxu0 %v3398_v13  ;;  %1229 = vmatpush1.msra.mxu1 %v3399_v14 }
 0x324   :  { %1159 = vmatprep.subr.mxu0 %v3400_v15  ;;  %1230 = vmatprep.subr.mxu1 %v3401_v16 }
 0x325   :  { %1160 = vmatpush1.msra.mxu0 %v3402_v17  ;;  %1231 = vmatpush1.msra.mxu1 %v3403_v19 }
 0x326   :  { %1161 = vmatprep.subr.mxu0 %v3404_v20  ;;  %1232 = vmatprep.subr.mxu1 %v3405_v21 }
 0x327   :  { %1162 = vmatpush1.msra.mxu0 %v3406_v22  ;;  %1233 = vmatpush1.msra.mxu1 %v3407_v23  ;;  %v3429_v22 = vld [vmem:[#allocation15_spill] sm:$0xff]  ;;  %v3430_v23 = vld [vmem:[#allocation16_spill] sm:$0xff] }
 0x328   :  { %1163 = vmatprep.subr.mxu0 %v3408_v24  ;;  %1234 = vmatprep.subr.mxu1 %v3409_v25  ;;  %v2924_v24 = vld [vmem:[#allocation5 + $0x128] sm:$0xff]  ;;  %v2927_v25 = vld [vmem:[#allocation5 + $0x138] sm:$0xff] }
 0x329   :  { %1164 = vmatpush1.msra.mxu0 %v3410_v26  ;;  %1235 = vmatpush1.msra.mxu1 %v3411_v28  ;;  %v2930_v26 = vld [vmem:[#allocation5 + $0x120] sm:$0xff]  ;;  %v2933_v28 = vld [vmem:[#allocation5 + $0x130] sm:$0xff] }
 0x32a   :  { %1165 = vmatprep.subr.mxu0 %v3412_v29  ;;  %1236 = vmatprep.subr.mxu1 %v3413_v30  ;;  %v2936_v29 = vld [vmem:[#allocation5 + $0x108] sm:$0xff]  ;;  %v2939_v30 = vld [vmem:[#allocation5 + $0x118] sm:$0xff] }
 0x32b   :  { %1166 = vmatpush1.msra.mxu0 %v3414_v31  ;;  %1199 = vmatprep.mubr.f32.mxu0 %v3415_v32  ;;  %v2942_v31 = vld [vmem:[#allocation5 + $0x100] sm:$0xff] }
 0x32c   :  { %1237 = vmatpush1.msra.mxu1 %v3416_v33  ;;  %1270 = vmatprep.mubr.f32.mxu1 %v3415_v32  ;;  %v2945_v33 = vld [vmem:[#allocation5 + $0x110] sm:$0xff] }
 0x32d   :  { %1308 = vmatprep.subr.mxu0 %v2770_v34  ;;  %1379 = vmatprep.subr.mxu1 %v2773_v35 }
 0x3cc   :  { %v1028_v37 = vpop.f32.mrf.mxu0  ;;  %v1099_v38 = vpop.f32.mrf.mxu1 }
 0x3cd   :  { %v1104_v40 = vadd.f32 %v1028_v37, %v3425_v39  ;;  %v1106_v51 = vadd.f32 %v1099_v38, %v3428_v50  ;;  %v2951_v37 = vld [vmem:[#allocation5 + $0xf8] sm:$0xff]  ;;  %v2954_v38 = vld [vmem:[#allocation5 + $0xe0] sm:$0xff]  ;;  %v2957_v39 = vld [vmem:[#allocation5 + $0xf0] sm:$0xff] }
 0x3ce   :  { %v1030_v41 = vpop.f32.mrf.mxu0  ;;  %v1101_v42 = vpop.f32.mrf.mxu1  ;;  %v2987_v50 = vld [vmem:[#allocation5 + $0x98] sm:$0xff] }
 0x3cf   :  { %v1108_v43 = vmul.f32 0.5, %v1104_v40  ;;  %v1105_v46 = vadd.f32 %v1030_v41, %v3426_v44  ;;  %v1107_v49 = vadd.f32 %v1101_v42, %v3427_v48  ;;  %v1110_v52 = vmul.f32 0.5, %v1106_v51  ;;  %v2960_v40 = vld [vmem:[#allocation5 + $0xc8] sm:$0xff]  ;;  %v2963_v41 = vld [vmem:[#allocation5 + $0xd8] sm:$0xff]  ;;  %v2966_v42 = vld [vmem:[#allocation5 + $0xc0] sm:$0xff]  ;;  %3431 = vst [vmem:[#allocation38_spill] sm:$0xff] %v2987_v50 }
 0x3d0   :  { %v2972_v44 = vld [vmem:[#allocation5 + $0xa8] sm:$0xff]  ;;  %v2981_v48 = vld [vmem:[#allocation5 + $0xb0] sm:$0xff]  ;;  %v2990_v51 = vld [vmem:[#allocation5 + $0x80] sm:$0xff] }
 0x3d1   :  { %1933 = vtanh.f32 %v1108_v43  ;;  %v1109_v47 = vmul.f32 0.5, %v1105_v46  ;;  %v2969_v43 = vld [vmem:[#allocation5 + $0xd0] sm:$0xff]  ;;  %v2975_v46 = vld [vmem:[#allocation5 + $0xb8] sm:$0xff]  ;;  %3432 = vst [vmem:[#allocation40_spill] sm:$0xff] %v2990_v51 }
 0x3d3   :  { %1935 = vtanh.f32 %v1109_v47  ;;  %v2978_v47 = vld [vmem:[#allocation5 + $0xa0] sm:$0xff] }
 0x3d4   :  { %1937 = vtanh.f32 %v1107_v49  ;;  %v2984_v49 = vld [vmem:[#allocation5 + $0x88] sm:$0xff] }
 0x3d5   :  { %1939 = vtanh.f32 %v1110_v52  ;;  %v2993_v52 = vld [vmem:[#allocation5 + $0x90] sm:$0xff] }
 0x3d6   :  { %3433 = vst [vmem:[#allocation41_spill] sm:$0xff] %v2993_v52 }
 0x3de   :  { %v1934_v53 = vpop.eup %1933 }
 0x3df   :  { %v1114_v55 = vmul.f32 0.5, %v1934_v53  ;;  %v2996_v53 = vld [vmem:[#allocation5 + $0x68] sm:$0xff] }
 0x3e0   :  { %v1936_v56 = vpop.eup %1935  ;;  %3434 = vst [vmem:[#allocation39_spill] sm:$0xff] %v2996_v53 }
 0x3e1   :  { %v1117_v57 = vadd.f32 0.5, %v1114_v55  ;;  %v1115_v62 = vmul.f32 0.5, %v1936_v56  ;;  %v1938_v36 = vpop.eup %1937  ;;  %v2999_v55 = vld [vmem:[#allocation5 + $0x78] sm:$0xff]  ;;  %v3002_v56 = vld [vmem:[#allocation5 + $0x60] sm:$0xff] }
 0x3e2   :  { %v1940_v16 = vpop.eup %1939  ;;  %3435 = vst [vmem:[#allocation19_spill] sm:$0xff] %v2999_v55  ;;  %3436 = vst [vmem:[#allocation20_spill] sm:$0xff] %v3002_v56 }
 0x3e3   :  { %v1118_v12 = vadd.f32 0.5, %v1115_v62  ;;  %v1122_v13 = vmul.f32 %v1938_v36, %v1117_v57  ;;  %v1116_v17 = vmul.f32 0.5, %v1940_v16  ;;  %v3005_v57 = vld [vmem:[#allocation5 + $0x70] sm:$0xff]  ;;  %v3008_v62 = vld [vmem:[#allocation5 + $0x48] sm:$0xff]  ;;  %v3011_v36 = vld [vmem:[#allocation5 + $0x58] sm:$0xff] }
 0x3e4   :  { %3437 = vst [vmem:[#allocation21_spill] sm:$0xff] %v3005_v57  ;;  %3438 = vst [vmem:[#allocation22_spill] sm:$0xff] %v3008_v62  ;;  %v3023_v16 = vld [vmem:[#allocation5 + $0x38] sm:$0xff] }
 0x3e5   :  { %v1121_v14 = vmul.f32 %v1118_v12, %v2781_v63  ;;  %v1119_v19 = vadd.f32 0.5, %v1116_v17  ;;  %v2948_v63 = vld [vmem:[#allocation5 + $0xe8] sm:$0xff]  ;;  %3439 = vst [vmem:[#allocation23_spill] sm:$0xff] %v3011_v36  ;;  %v3014_v12 = vld [vmem:[#allocation5 + $0x40] sm:$0xff]  ;;  %3443 = vst [vmem:[#allocation27_spill] sm:$0xff] %v3023_v16 }
 0x3e6   :  { %3440 = vst [vmem:[#allocation24_spill] sm:$0xff] %v3014_v12  ;;  %v3026_v17 = vld [vmem:[#allocation5 + $0x20] sm:$0xff] }
 0x3e7   :  { %v2899_v15 = vadd.f32 %v1122_v13, %v1121_v14  ;;  %v3017_v13 = vld [vmem:[#allocation5 + $0x50] sm:$0xff]  ;;  %v3020_v14 = vld [vmem:[#allocation5 + $0x28] sm:$0xff]  ;;  %3444 = vst [vmem:[#allocation28_spill] sm:$0xff] %v3026_v17 }
 0x3e8   :  { %3441 = vst [vmem:[#allocation25_spill] sm:$0xff] %v3017_v13  ;;  %3442 = vst [vmem:[#allocation26_spill] sm:$0xff] %v3020_v14 }
 0x3e9   :  { %1941 = vtanh.f32 %v2899_v15 }
 0x3f6   :  { %v1942_v20 = vpop.eup %1941 }
 0x3f7   :  { %v1125_v21 = vmul.f32 %v1942_v20, %v1119_v19  ;;  %v3029_v19 = vld [vmem:[#allocation5 + $0x30] sm:$0xff]  ;;  %v3032_v20 = vld [vmem:[#allocation5 + $0x8] sm:$0xff] }
 0x3f8   :  { %3445 = vst [vmem:[#allocation29_spill] sm:$0xff] %v3029_v19  ;;  %3446 = vst [vmem:[#allocation30_spill] sm:$0xff] %v3032_v20 }
 0x3f9   :  { %1127 = vst [vmem:[#allocation8 + $0x18] sm:$0xff] %v1125_v21  ;;  %1200 = vmatmul.mubr.f32.vlgmr.msra.gmra.mxu0 %v1125_v21  ;;  %1271 = vmatmul.mubr.f32.vlgmr.msra.gmra.mxu1 %v1125_v21  ;;  %v3035_v21 = vld [vmem:[#allocation5 + $0x18] sm:$0xff] }
 0x3fa   :  { %1309 = vmatpush1.msra.mxu0 %v2784_v27  ;;  %1380 = vmatpush1.msra.mxu1 %v2787_v4  ;;  %3447 = vst [vmem:[#allocation31_spill] sm:$0xff] %v3035_v21 }
 0x3fb   :  { %1310 = vmatprep.subr.mxu0 %v2790_v2  ;;  %1381 = vmatprep.subr.mxu1 %v2793_v59 }
 0x3fc   :  { %1311 = vmatpush1.msra.mxu0 %v2796_v11  ;;  %1382 = vmatpush1.msra.mxu1 %v2799_v3 }
 0x3fd   :  { %1312 = vmatprep.subr.mxu0 %v2802_v5  ;;  %1383 = vmatprep.subr.mxu1 %v2805_v7 }
 0x3fe   :  { %1313 = vmatpush1.msra.mxu0 %v2808_v9  ;;  %1384 = vmatpush1.msra.mxu1 %v2811_v61 }
 0x3ff   :  { %1314 = vmatprep.subr.mxu0 %v2814_v58  ;;  %1385 = vmatprep.subr.mxu1 %v2817_v1 }
 0x400   :  { %1315 = vmatpush1.msra.mxu0 %v2820_v0  ;;  %1386 = vmatpush1.msra.mxu1 %v2823_v10 }
 0x401   :  { %1316 = vmatprep.subr.mxu0 %v3429_v22  ;;  %1387 = vmatprep.subr.mxu1 %v3430_v23 }
 0x402   :  { %1317 = vmatpush1.msra.mxu0 %v2832_v18  ;;  %1388 = vmatpush1.msra.mxu1 %v2835_v6 }
 0x403   :  { %1318 = vmatprep.subr.mxu0 %v2838_v54  ;;  %1389 = vmatprep.subr.mxu1 %v2841_v8 }
 0x404   :  { %1319 = vmatpush1.msra.mxu0 %v2844_v60  ;;  %1390 = vmatpush1.msra.mxu1 %v2847_v45 }
 0x405   :  { %1320 = vmatprep.subr.mxu0 %v2924_v24  ;;  %1391 = vmatprep.subr.mxu1 %v2927_v25 }
 0x406   :  { %1321 = vmatpush1.msra.mxu0 %v2930_v26  ;;  %1392 = vmatpush1.msra.mxu1 %v2933_v28 }
 0x407   :  { %1322 = vmatprep.subr.mxu0 %v2936_v29  ;;  %1393 = vmatprep.subr.mxu1 %v2939_v30 }
 0x408   :  { %1323 = vmatpush1.msra.mxu0 %v2942_v31  ;;  %1394 = vmatpush1.msra.mxu1 %v2945_v33 }
 0x409   :  { %1324 = vmatprep.subr.mxu0 %v2948_v63  ;;  %1395 = vmatprep.subr.mxu1 %v2951_v37 }
 0x40a   :  { %1325 = vmatpush1.msra.mxu0 %v2954_v38  ;;  %1396 = vmatpush1.msra.mxu1 %v2957_v39 }
 0x40b   :  { %1326 = vmatprep.subr.mxu0 %v2960_v40  ;;  %1397 = vmatprep.subr.mxu1 %v2963_v41 }
 0x40c   :  { %1327 = vmatpush1.msra.mxu0 %v2966_v42  ;;  %1398 = vmatpush1.msra.mxu1 %v2969_v43 }
 0x40d   :  { %1328 = vmatprep.subr.mxu0 %v2972_v44  ;;  %1399 = vmatprep.subr.mxu1 %v2975_v46 }
 0x40e   :  { %1329 = vmatpush1.msra.mxu0 %v2978_v47  ;;  %1400 = vmatpush1.msra.mxu1 %v2981_v48 }
 0x40f   :  { %1330 = vmatprep.subr.mxu0 %v2984_v49  ;;  %1401 = vmatprep.subr.mxu1 %v2987_v50 }
 0x410   :  { %1331 = vmatpush1.msra.mxu0 %v2990_v51  ;;  %1402 = vmatpush1.msra.mxu1 %v2993_v52 }
 0x411   :  { %1332 = vmatprep.subr.mxu0 %v2996_v53  ;;  %1403 = vmatprep.subr.mxu1 %v2999_v55 }
 0x412   :  { %1333 = vmatpush1.msra.mxu0 %v3002_v56  ;;  %1404 = vmatpush1.msra.mxu1 %v3005_v57  ;;  %v3452_v56 = vld [vmem:[#allocation53_spill] sm:$0xff] }
 0x413   :  { %1334 = vmatprep.subr.mxu0 %v3008_v62  ;;  %1405 = vmatprep.subr.mxu1 %v3011_v36 }
 0x414   :  { %1335 = vmatpush1.msra.mxu0 %v3014_v12  ;;  %1406 = vmatpush1.msra.mxu1 %v3017_v13 }
 0x415   :  { %1336 = vmatprep.subr.mxu0 %v3020_v14  ;;  %1407 = vmatprep.subr.mxu1 %v3023_v16  ;;  %v3038_v14 = vld [vmem:[#allocation5] sm:$0xff]  ;;  %v3042_v16 = vld [vmem:[#allocation5 + $0x10] sm:$0xff] }
 0x416   :  { %1337 = vmatpush1.msra.mxu0 %v3026_v17  ;;  %1408 = vmatpush1.msra.mxu1 %v3029_v19  ;;  %3448 = vst [vmem:[#allocation32_spill] sm:$0xff] %v3038_v14  ;;  %3449 = vst [vmem:[#allocation33_spill] sm:$0xff] %v3042_v16  ;;  %v3450_v17 = vld [vmem:[#allocation50_spill] sm:$0xff] }
 0x417   :  { %1338 = vmatprep.subr.mxu0 %v3032_v20  ;;  %1409 = vmatprep.subr.mxu1 %v3035_v21 }
 0x418   :  { %1339 = vmatpush1.msra.mxu0 %v3038_v14  ;;  %1372 = vmatprep.mubr.f32.mxu0 %v3415_v32  ;;  %v3451_v14 = vld [vmem:[#allocation52_spill] sm:$0xff] }
 0x419   :  { %1410 = vmatpush1.msra.mxu1 %v3042_v16  ;;  %1443 = vmatprep.mubr.f32.mxu1 %v3415_v32  ;;  %v3453_v16 = vld [vmem:[#allocation51_spill] sm:$0xff] }
 0x41a   :  { %1481 = vmatprep.subr.mxu0 %v2770_v34  ;;  %1552 = vmatprep.subr.mxu1 %v2773_v35 }
 0x4b9   :  { %v1201_v20 = vpop.f32.mrf.mxu0  ;;  %v1272_v19 = vpop.f32.mrf.mxu1 }
 0x4ba   :  { %v1277_v21 = vadd.f32 %v1201_v20, %v3450_v17  ;;  %v1279_v32 = vadd.f32 %v1272_v19, %v3453_v16  ;;  %v3463_v16 = vld [vmem:[#allocation24_spill] sm:$0xff]  ;;  %v3464_v19 = vld [vmem:[#allocation25_spill] sm:$0xff] }
 0x4bb   :  { %v1203_v13 = vpop.f32.mrf.mxu0  ;;  %v1274_v12 = vpop.f32.mrf.mxu1 }
 0x4bc   :  { %v1281_v36 = vmul.f32 0.5, %v1277_v21  ;;  %v1278_v62 = vadd.f32 %v1203_v13, %v3451_v14  ;;  %v1280_v55 = vadd.f32 %v1274_v12, %v3452_v56  ;;  %v1283_v34 = vmul.f32 0.5, %v1279_v32  ;;  %v3461_v12 = vld [vmem:[#allocation22_spill] sm:$0xff]  ;;  %v3462_v14 = vld [vmem:[#allocation23_spill] sm:$0xff] }
 0x4be   :  { %1943 = vtanh.f32 %v1281_v36  ;;  %v1282_v57 = vmul.f32 0.5, %v1278_v62 }
 0x4c0   :  { %1945 = vtanh.f32 %v1282_v57 }
 0x4c1   :  { %1947 = vtanh.f32 %v1280_v55 }
 0x4c2   :  { %1949 = vtanh.f32 %v1283_v34  ;;  %v3454_v34 = vld [vmem:[#allocation38_spill] sm:$0xff] }
 0x4cb   :  { %v1944_v53 = vpop.eup %1943 }
 0x4cc   :  { %v1287_v35 = vmul.f32 0.5, %v1944_v53  ;;  %v3460_v53 = vld [vmem:[#allocation21_spill] sm:$0xff] }
 0x4cd   :  { %v1946_v52 = vpop.eup %1945 }
 0x4ce   :  { %v1290_v51 = vadd.f32 0.5, %v1287_v35  ;;  %v1288_v17 = vmul.f32 0.5, %v1946_v52  ;;  %v1948_v20 = vpop.eup %1947  ;;  %v3455_v35 = vld [vmem:[#allocation40_spill] sm:$0xff] }
 0x4cf   :  { %v1950_v56 = vpop.eup %1949  ;;  %v3459_v52 = vld [vmem:[#allocation20_spill] sm:$0xff] }
 0x4d0   :  { %v1291_v50 = vadd.f32 0.5, %v1288_v17  ;;  %v1295_v21 = vmul.f32 %v1948_v20, %v1290_v51  ;;  %v1289_v55 = vmul.f32 0.5, %v1950_v56  ;;  %v3458_v51 = vld [vmem:[#allocation19_spill] sm:$0xff]  ;;  %v3465_v17 = vld [vmem:[#allocation26_spill] sm:$0xff] }
 0x4d1   :  { %v3466_v20 = vld [vmem:[#allocation27_spill] sm:$0xff]  ;;  %v3469_v56 = vld [vmem:[#allocation30_spill] sm:$0xff] }
 0x4d2   :  { %v1294_v13 = vmul.f32 %v1291_v50, %v2899_v15  ;;  %v1292_v57 = vadd.f32 0.5, %v1289_v55  ;;  %v3456_v15 = vld [vmem:[#allocation41_spill] sm:$0xff]  ;;  %v3457_v50 = vld [vmem:[#allocation39_spill] sm:$0xff] }
 0x4d3   :  { %v3470_v55 = vld [vmem:[#allocation31_spill] sm:$0xff] }
 0x4d4   :  { %v3053_v36 = vadd.f32 %v1295_v21, %v1294_v13  ;;  %v3467_v21 = vld [vmem:[#allocation28_spill] sm:$0xff]  ;;  %v3468_v13 = vld [vmem:[#allocation29_spill] sm:$0xff] }
 0x4d6   :  { %1951 = vtanh.f32 %v3053_v36 }
 0x4e3   :  { %v1952_v62 = vpop.eup %1951 }
 0x4e4   :  { %v1298_v32 = vmul.f32 %v1952_v62, %v1292_v57  ;;  %v3471_v57 = vld [vmem:[#allocation32_spill] sm:$0xff]  ;;  %v3472_v62 = vmov 0.0  }
 0x4e6   :  { %1300 = vst [vmem:[#allocation8 + $0x20] sm:$0xff] %v1298_v32  ;;  %1373 = vmatmul.mubr.f32.vlgmr.msra.gmra.mxu0 %v1298_v32  ;;  %1444 = vmatmul.mubr.f32.vlgmr.msra.gmra.mxu1 %v1298_v32  ;;  %v3473_v32 = vld [vmem:[#allocation33_spill] sm:$0xff] }
 0x4e7   :  { %1482 = vmatpush1.msra.mxu0 %v2784_v27  ;;  %1553 = vmatpush1.msra.mxu1 %v2787_v4 }
 0x4e8   :  { %1483 = vmatprep.subr.mxu0 %v2790_v2  ;;  %1554 = vmatprep.subr.mxu1 %v2793_v59 }
 0x4e9   :  { %1484 = vmatpush1.msra.mxu0 %v2796_v11  ;;  %1555 = vmatpush1.msra.mxu1 %v2799_v3 }
 0x4ea   :  { %1485 = vmatprep.subr.mxu0 %v2802_v5  ;;  %1556 = vmatprep.subr.mxu1 %v2805_v7 }
 0x4eb   :  { %1486 = vmatpush1.msra.mxu0 %v2808_v9  ;;  %1557 = vmatpush1.msra.mxu1 %v2811_v61 }
 0x4ec   :  { %1487 = vmatprep.subr.mxu0 %v2814_v58  ;;  %1558 = vmatprep.subr.mxu1 %v2817_v1 }
 0x4ed   :  { %1488 = vmatpush1.msra.mxu0 %v2820_v0  ;;  %1559 = vmatpush1.msra.mxu1 %v2823_v10 }
 0x4ee   :  { %1489 = vmatprep.subr.mxu0 %v3429_v22  ;;  %1560 = vmatprep.subr.mxu1 %v3430_v23 }
 0x4ef   :  { %1490 = vmatpush1.msra.mxu0 %v2832_v18  ;;  %1561 = vmatpush1.msra.mxu1 %v2835_v6 }
 0x4f0   :  { %1491 = vmatprep.subr.mxu0 %v2838_v54  ;;  %1562 = vmatprep.subr.mxu1 %v2841_v8 }
 0x4f1   :  { %1492 = vmatpush1.msra.mxu0 %v2844_v60  ;;  %1563 = vmatpush1.msra.mxu1 %v2847_v45 }
 0x4f2   :  { %1493 = vmatprep.subr.mxu0 %v2924_v24  ;;  %1564 = vmatprep.subr.mxu1 %v2927_v25 }
 0x4f3   :  { %1494 = vmatpush1.msra.mxu0 %v2930_v26  ;;  %1565 = vmatpush1.msra.mxu1 %v2933_v28 }
 0x4f4   :  { %1495 = vmatprep.subr.mxu0 %v2936_v29  ;;  %1566 = vmatprep.subr.mxu1 %v2939_v30 }
 0x4f5   :  { %1496 = vmatpush1.msra.mxu0 %v2942_v31  ;;  %1567 = vmatpush1.msra.mxu1 %v2945_v33 }
 0x4f6   :  { %1497 = vmatprep.subr.mxu0 %v2948_v63  ;;  %1568 = vmatprep.subr.mxu1 %v2951_v37 }
 0x4f7   :  { %1498 = vmatpush1.msra.mxu0 %v2954_v38  ;;  %1569 = vmatpush1.msra.mxu1 %v2957_v39 }
 0x4f8   :  { %1499 = vmatprep.subr.mxu0 %v2960_v40  ;;  %1570 = vmatprep.subr.mxu1 %v2963_v41 }
 0x4f9   :  { %1500 = vmatpush1.msra.mxu0 %v2966_v42  ;;  %1571 = vmatpush1.msra.mxu1 %v2969_v43 }
 0x4fa   :  { %1501 = vmatprep.subr.mxu0 %v2972_v44  ;;  %1572 = vmatprep.subr.mxu1 %v2975_v46 }
 0x4fb   :  { %1502 = vmatpush1.msra.mxu0 %v2978_v47  ;;  %1573 = vmatpush1.msra.mxu1 %v2981_v48 }
 0x4fc   :  { %1503 = vmatprep.subr.mxu0 %v2984_v49  ;;  %1574 = vmatprep.subr.mxu1 %v3454_v34 }
 0x4fd   :  { %1504 = vmatpush1.msra.mxu0 %v3455_v35  ;;  %1575 = vmatpush1.msra.mxu1 %v3456_v15 }
 0x4fe   :  { %1505 = vmatprep.subr.mxu0 %v3457_v50  ;;  %1576 = vmatprep.subr.mxu1 %v3458_v51 }
 0x4ff   :  { %1506 = vmatpush1.msra.mxu0 %v3459_v52  ;;  %1577 = vmatpush1.msra.mxu1 %v3460_v53  ;;  %v3478_v52 = vld [vmem:[#allocation57_spill] sm:$0xff] }
 0x500   :  { %1507 = vmatprep.subr.mxu0 %v3461_v12  ;;  %1578 = vmatprep.subr.mxu1 %v3462_v14 }
 0x501   :  { %1508 = vmatpush1.msra.mxu0 %v3463_v16  ;;  %1579 = vmatpush1.msra.mxu1 %v3464_v19  ;;  %v3474_v19 = vld [vmem:[#allocation17_spill] sm:$0xff]  ;;  %v3476_v16 = vld [vmem:[#allocation54_spill] sm:$0xff] }
 0x502   :  { %1509 = vmatprep.subr.mxu0 %v3465_v17  ;;  %1580 = vmatprep.subr.mxu1 %v3466_v20  ;;  %v3475_v17 = vld [vmem:[#allocation18_spill] sm:$0xff] }
 0x503   :  { %1510 = vmatpush1.msra.mxu0 %v3467_v21  ;;  %1581 = vmatpush1.msra.mxu1 %v3468_v13 }
 0x504   :  { %1511 = vmatprep.subr.mxu0 %v3469_v56  ;;  %1582 = vmatprep.subr.mxu1 %v3470_v55  ;;  %v3477_v55 = vld [vmem:[#allocation56_spill] sm:$0xff] }
 0x505   :  { %1512 = vmatpush1.msra.mxu0 %v3471_v57  ;;  %1545 = vmatprep.mubr.f32.mxu0 %v3472_v62 }
 0x506   :  { %1583 = vmatpush1.msra.mxu1 %v3473_v32  ;;  %1616 = vmatprep.mubr.f32.mxu1 %v3472_v62  ;;  %v3479_v32 = vld [vmem:[#allocation55_spill] sm:$0xff] }
 0x507   :  { %1654 = vmatprep.subr.mxu0 %v3474_v19  ;;  %1725 = vmatprep.subr.mxu1 %v3475_v17 }
 0x5a6   :  { %v1374_v20 = vpop.f32.mrf.mxu0  ;;  %v1445_v21 = vpop.f32.mrf.mxu1 }
 0x5a7   :  { %v1450_v13 = vadd.f32 %v1374_v20, %v3476_v16  ;;  %v1452_v62 = vadd.f32 %v1445_v21, %v3479_v32 }
 0x5a8   :  { %v1376_v14 = vpop.f32.mrf.mxu0  ;;  %v1447_v56 = vpop.f32.mrf.mxu1 }
 0x5a9   :  { %v1454_v12 = vmul.f32 0.5, %v1450_v13  ;;  %v1451_v53 = vadd.f32 %v1376_v14, %v3477_v55  ;;  %v1453_v51 = vadd.f32 %v1447_v56, %v3478_v52  ;;  %v1456_v19 = vmul.f32 0.5, %v1452_v62 }
 0x5ab   :  { %1953 = vtanh.f32 %v1454_v12  ;;  %v1455_v57 = vmul.f32 0.5, %v1451_v53 }
 0x5ad   :  { %1955 = vtanh.f32 %v1455_v57 }
 0x5ae   :  { %1957 = vtanh.f32 %v1453_v51 }
 0x5af   :  { %1959 = vtanh.f32 %v1456_v19  ;;  %v3504_v19 = vld [vmem:[#allocation62_spill] sm:$0xff] }
 0x5b8   :  { %v1954_v50 = vpop.eup %1953 }
 0x5b9   :  { %v1460_v17 = vmul.f32 0.5, %v1954_v50 }
 0x5ba   :  { %v1956_v15 = vpop.eup %1955 }
 0x5bb   :  { %v1463_v35 = vadd.f32 0.5, %v1460_v17  ;;  %v1461_v16 = vmul.f32 0.5, %v1956_v15  ;;  %v1958_v20 = vpop.eup %1957 }
 0x5bc   :  { %v1960_v52 = vpop.eup %1959 }
 0x5bd   :  { %v1464_v34 = vadd.f32 0.5, %v1461_v16  ;;  %v1468_v13 = vmul.f32 %v1958_v20, %v1463_v35  ;;  %v1462_v51 = vmul.f32 0.5, %v1960_v52 }
 0x5bf   :  { %v1467_v14 = vmul.f32 %v1464_v34, %v3053_v36  ;;  %v1465_v53 = vadd.f32 0.5, %v1462_v51  ;;  %v3506_v51 = vld [vmem:[#allocation65_spill] sm:$0xff] }
 0x5c1   :  { %v3127_v12 = vadd.f32 %v1468_v13, %v1467_v14  ;;  %v3505_v14 = vld [vmem:[#allocation64_spill] sm:$0xff] }
 0x5c3   :  { %1961 = vtanh.f32 %v3127_v12 }
 0x5d0   :  { %v1962_v21 = vpop.eup %1961 }
 0x5d1   :  { %v1471_v56 = vmul.f32 %v1962_v21, %v1465_v53  ;;  %v3507_v21 = vld [vmem:[#allocation63_spill] sm:$0xff] }
 0x5d3   :  { %1473 = vst [vmem:[#allocation8 + $0x28] sm:$0xff] %v1471_v56  ;;  %1546 = vmatmul.mubr.f32.vlgmr.msra.gmra.mxu0 %v1471_v56  ;;  %1617 = vmatmul.mubr.f32.vlgmr.msra.gmra.mxu1 %v1471_v56 }
 0x5d4   :  { %1655 = vmatpush1.msra.mxu0 %v2784_v27  ;;  %1726 = vmatpush1.msra.mxu1 %v2787_v4  ;;  %v3480_v27 = vld [vmem:[#allocation38_spill] sm:$0xff]  ;;  %v3481_v4 = vld [vmem:[#allocation40_spill] sm:$0xff] }
 0x5d5   :  { %1656 = vmatprep.subr.mxu0 %v2790_v2  ;;  %1727 = vmatprep.subr.mxu1 %v2793_v59  ;;  %v3482_v2 = vld [vmem:[#allocation41_spill] sm:$0xff]  ;;  %v3483_v59 = vld [vmem:[#allocation39_spill] sm:$0xff] }
 0x5d6   :  { %1657 = vmatpush1.msra.mxu0 %v2796_v11  ;;  %1728 = vmatpush1.msra.mxu1 %v2799_v3  ;;  %v3484_v11 = vld [vmem:[#allocation19_spill] sm:$0xff]  ;;  %v3485_v3 = vld [vmem:[#allocation20_spill] sm:$0xff] }
 0x5d7   :  { %1658 = vmatprep.subr.mxu0 %v2802_v5  ;;  %1729 = vmatprep.subr.mxu1 %v2805_v7  ;;  %v3486_v5 = vld [vmem:[#allocation21_spill] sm:$0xff]  ;;  %v3487_v7 = vld [vmem:[#allocation22_spill] sm:$0xff] }
 0x5d8   :  { %1659 = vmatpush1.msra.mxu0 %v2808_v9  ;;  %1730 = vmatpush1.msra.mxu1 %v2811_v61  ;;  %v3488_v9 = vld [vmem:[#allocation23_spill] sm:$0xff]  ;;  %v3489_v61 = vld [vmem:[#allocation24_spill] sm:$0xff] }
 0x5d9   :  { %1660 = vmatprep.subr.mxu0 %v2814_v58  ;;  %1731 = vmatprep.subr.mxu1 %v2817_v1  ;;  %v3490_v58 = vld [vmem:[#allocation25_spill] sm:$0xff]  ;;  %v3491_v1 = vld [vmem:[#allocation26_spill] sm:$0xff] }
 0x5da   :  { %1661 = vmatpush1.msra.mxu0 %v2820_v0  ;;  %1732 = vmatpush1.msra.mxu1 %v2823_v10  ;;  %v3492_v0 = vld [vmem:[#allocation27_spill] sm:$0xff]  ;;  %v3493_v10 = vld [vmem:[#allocation28_spill] sm:$0xff] }
 0x5db   :  { %1662 = vmatprep.subr.mxu0 %v3429_v22  ;;  %1733 = vmatprep.subr.mxu1 %v3430_v23 }
 0x5dc   :  { %1663 = vmatpush1.msra.mxu0 %v2832_v18  ;;  %1734 = vmatpush1.msra.mxu1 %v2835_v6  ;;  %v3496_v18 = vld [vmem:[#allocation31_spill] sm:$0xff]  ;;  %v3497_v6 = vld [vmem:[#allocation32_spill] sm:$0xff] }
 0x5dd   :  { %1664 = vmatprep.subr.mxu0 %v2838_v54  ;;  %1735 = vmatprep.subr.mxu1 %v2841_v8  ;;  %v3498_v54 = vmov 0.0   ;;  %v3499_v8 = vld [vmem:[#allocation33_spill] sm:$0xff] }
 0x5de   :  { %1665 = vmatpush1.msra.mxu0 %v2844_v60  ;;  %1736 = vmatpush1.msra.mxu1 %v2847_v45  ;;  %v3494_v60 = vld [vmem:[#allocation29_spill] sm:$0xff]  ;;  %v3495_v45 = vld [vmem:[#allocation30_spill] sm:$0xff] }
 0x5df   :  { %1666 = vmatprep.subr.mxu0 %v2924_v24  ;;  %1737 = vmatprep.subr.mxu1 %v2927_v25  ;;  %v3500_v24 = vld [vmem:[#allocation58_spill] sm:$0xff] }
 0x5e0   :  { %1667 = vmatpush1.msra.mxu0 %v2930_v26  ;;  %1738 = vmatpush1.msra.mxu1 %v2933_v28 }
 0x5e1   :  { %1668 = vmatprep.subr.mxu0 %v2936_v29  ;;  %1739 = vmatprep.subr.mxu1 %v2939_v30  ;;  %v3501_v30 = vld [vmem:[#allocation60_spill] sm:$0xff] }
 0x5e2   :  { %1669 = vmatpush1.msra.mxu0 %v2942_v31  ;;  %1740 = vmatpush1.msra.mxu1 %v2945_v33 }
 0x5e3   :  { %1670 = vmatprep.subr.mxu0 %v2948_v63  ;;  %1741 = vmatprep.subr.mxu1 %v2951_v37  ;;  %v3502_v63 = vld [vmem:[#allocation61_spill] sm:$0xff] }
 0x5e4   :  { %1671 = vmatpush1.msra.mxu0 %v2954_v38  ;;  %1742 = vmatpush1.msra.mxu1 %v2957_v39  ;;  %v3503_v38 = vld [vmem:[#allocation59_spill] sm:$0xff] }
 0x5e5   :  { %1672 = vmatprep.subr.mxu0 %v2960_v40  ;;  %1743 = vmatprep.subr.mxu1 %v2963_v41 }
 0x5e6   :  { %1673 = vmatpush1.msra.mxu0 %v2966_v42  ;;  %1744 = vmatpush1.msra.mxu1 %v2969_v43 }
 0x5e7   :  { %1674 = vmatprep.subr.mxu0 %v2972_v44  ;;  %1745 = vmatprep.subr.mxu1 %v2975_v46 }
 0x5e8   :  { %1675 = vmatpush1.msra.mxu0 %v2978_v47  ;;  %1746 = vmatpush1.msra.mxu1 %v2981_v48 }
 0x5e9   :  { %1676 = vmatprep.subr.mxu0 %v2984_v49  ;;  %1747 = vmatprep.subr.mxu1 %v3480_v27 }
 0x5ea   :  { %1677 = vmatpush1.msra.mxu0 %v3481_v4  ;;  %1748 = vmatpush1.msra.mxu1 %v3482_v2 }
 0x5eb   :  { %1678 = vmatprep.subr.mxu0 %v3483_v59  ;;  %1749 = vmatprep.subr.mxu1 %v3484_v11 }
 0x5ec   :  { %1679 = vmatpush1.msra.mxu0 %v3485_v3  ;;  %1750 = vmatpush1.msra.mxu1 %v3486_v5 }
 0x5ed   :  { %1680 = vmatprep.subr.mxu0 %v3487_v7  ;;  %1751 = vmatprep.subr.mxu1 %v3488_v9 }
 0x5ee   :  { %1681 = vmatpush1.msra.mxu0 %v3489_v61  ;;  %1752 = vmatpush1.msra.mxu1 %v3490_v58 }
 0x5ef   :  { %1682 = vmatprep.subr.mxu0 %v3491_v1  ;;  %1753 = vmatprep.subr.mxu1 %v3492_v0 }
 0x5f0   :  { %1683 = vmatpush1.msra.mxu0 %v3493_v10  ;;  %1754 = vmatpush1.msra.mxu1 %v3494_v60 }
 0x5f1   :  { %1684 = vmatprep.subr.mxu0 %v3495_v45  ;;  %1755 = vmatprep.subr.mxu1 %v3496_v18 }
 0x5f2   :  { %1685 = vmatpush1.msra.mxu0 %v3497_v6  ;;  %1718 = vmatprep.mubr.f32.mxu0 %v3498_v54 }
 0x5f3   :  { %1756 = vmatpush1.msra.mxu1 %v3499_v8  ;;  %1789 = vmatprep.mubr.f32.mxu1 %v3498_v54 }
 0x693   :  { %v1547_v22 = vpop.f32.mrf.mxu0  ;;  %v1618_v23 = vpop.f32.mrf.mxu1 }
 0x694   :  { %v1623_v25 = vadd.f32 %v1547_v22, %v3500_v24  ;;  %v1625_v39 = vadd.f32 %v1618_v23, %v3503_v38 }
 0x695   :  { %v1549_v26 = vpop.f32.mrf.mxu0  ;;  %v1620_v28 = vpop.f32.mrf.mxu1 }
 0x696   :  { %v1627_v29 = vmul.f32 0.5, %v1623_v25  ;;  %v1624_v31 = vadd.f32 %v1549_v26, %v3501_v30  ;;  %v1626_v37 = vadd.f32 %v1620_v28, %v3502_v63  ;;  %v1629_v40 = vmul.f32 0.5, %v1625_v39 }
 0x698   :  { %1963 = vtanh.f32 %v1627_v29  ;;  %v1628_v33 = vmul.f32 0.5, %v1624_v31 }
 0x69a   :  { %1965 = vtanh.f32 %v1628_v33 }
 0x69b   :  { %1967 = vtanh.f32 %v1626_v37 }
 0x69c   :  { %1969 = vtanh.f32 %v1629_v40 }
 0x6a5   :  { %v1964_v41 = vpop.eup %1963 }
 0x6a6   :  { %v1633_v42 = vmul.f32 0.5, %v1964_v41 }
 0x6a7   :  { %v1966_v43 = vpop.eup %1965 }
 0x6a8   :  { %v1636_v44 = vadd.f32 0.5, %v1633_v42  ;;  %v1634_v46 = vmul.f32 0.5, %v1966_v43  ;;  %v1968_v47 = vpop.eup %1967 }
 0x6a9   :  { %v1970_v35 = vpop.eup %1969 }
 0x6aa   :  { %v1637_v48 = vadd.f32 0.5, %v1634_v46  ;;  %v1641_v49 = vmul.f32 %v1968_v47, %v1636_v44  ;;  %v1635_v15 = vmul.f32 0.5, %v1970_v35 }
 0x6ac   :  { %v1640_v36 = vmul.f32 %v1637_v48, %v3127_v12  ;;  %v1638_v50 = vadd.f32 0.5, %v1635_v15 }
 0x6ae   :  { %v1642_v34 = vadd.f32 %v1641_v49, %v1640_v36 }
 0x6b0   :  { %1971 = vtanh.f32 %v1642_v34 }
 0x6bd   :  { %v1972_v55 = vpop.eup %1971 }
 0x6be   :  { %v1644_v57 = vmul.f32 %v1972_v55, %v1638_v50 }
 0x6c0   :  { %1646 = vst [vmem:[#allocation8 + $0x30] sm:$0xff] %v1644_v57  ;;  %1719 = vmatmul.mubr.f32.vlgmr.msra.gmra.mxu0 %v1644_v57  ;;  %1790 = vmatmul.mubr.f32.vlgmr.msra.gmra.mxu1 %v1644_v57 }
 0x780   :  { %v1720_v62 = vpop.f32.mrf.mxu0  ;;  %v1791_v32 = vpop.f32.mrf.mxu1 }
 0x781   :  { %v1796_v17 = vadd.f32 %v1720_v62, %v3504_v19  ;;  %v1798_v56 = vadd.f32 %v1791_v32, %v3507_v21 }
 0x782   :  { %v1722_v16 = vpop.f32.mrf.mxu0  ;;  %v1793_v20 = vpop.f32.mrf.mxu1 }
 0x783   :  { %v1800_v13 = vmul.f32 0.5, %v1796_v17  ;;  %v1797_v52 = vadd.f32 %v1722_v16, %v3505_v14  ;;  %v1799_v53 = vadd.f32 %v1793_v20, %v3506_v51  ;;  %v1802_v27 = vmul.f32 0.5, %v1798_v56 }
 0x785   :  { %1973 = vtanh.f32 %v1800_v13  ;;  %v1801_v12 = vmul.f32 0.5, %v1797_v52 }
 0x787   :  { %1975 = vtanh.f32 %v1801_v12 }
 0x788   :  { %1977 = vtanh.f32 %v1799_v53 }
 0x789   :  { %1979 = vtanh.f32 %v1802_v27 }
 0x792   :  { %v1974_v4 = vpop.eup %1973 }
 0x793   :  { %v1806_v2 = vmul.f32 0.5, %v1974_v4 }
 0x794   :  { %v1976_v59 = vpop.eup %1975 }
 0x795   :  { %v1809_v11 = vadd.f32 0.5, %v1806_v2  ;;  %v1807_v3 = vmul.f32 0.5, %v1976_v59  ;;  %v1978_v5 = vpop.eup %1977 }
 0x796   :  { %v1980_v1 = vpop.eup %1979 }
 0x797   :  { %v1810_v7 = vadd.f32 0.5, %v1807_v3  ;;  %v1814_v9 = vmul.f32 %v1978_v5, %v1809_v11  ;;  %v1808_v0 = vmul.f32 0.5, %v1980_v1 }
 0x799   :  { %v1813_v61 = vmul.f32 %v1810_v7, %v1642_v34  ;;  %v1811_v10 = vadd.f32 0.5, %v1808_v0 }
 0x79b   :  { %v1815_v58 = vadd.f32 %v1814_v9, %v1813_v61 }
 0x79d   :  { %1826 = vst [vmem:[#allocation11] sm:$0xff] %v1815_v58  ;;  %1981 = vtanh.f32 %v1815_v58 }
 0x7aa   :  { %v1982_v60 = vpop.eup %1981 }
 0x7ab   :  { %v1817_v45 = vmul.f32 %v1982_v60, %v1811_v10 }
 0x7ad   :  { %1819 = vst [vmem:[#allocation8 + $0x38] sm:$0xff] %v1817_v45  ;;  %1825 = vst [vmem:[#allocation9] sm:$0xff] %v1817_v45 }
 0x7ae   :  { %2078 = shalt.err (!%p2075_p9)
}
 0x7af   :  { %1848 = dma.vmem_to_hbm [thread:$0]  %s1846_s22, 128, %s3219_s7, [#allocation10]  }
 0x7b0   :  { %s2087_s29 = scalar_lea.vmem %s1833_s24, 1024  ;;  %p2092_p11 = scmp.lt.s32.totalorder %s1833_s24, %s1833_s24 }
 0x7b1   :  { %p2088_p10 = scmp.ne.s32.totalorder %s1833_s24, %s2087_s29  ;;  %p2093_p12 = scmp.lt.s32.totalorder %s2087_s29, %s2087_s29 }
 0x7b3   :  { %p2094_p13 = por %p2093_p12, %p2092_p11 }
 0x7b5   :  { %p2095_p0 = pnand %p2094_p13, %p2088_p10 }
 0x7b7   :  { %2098 = shalt.err (!%p2095_p0)
}
 0x7b8   :  { %s2140_s30 = smov 128   ;;  %s2141_s9 = smov 8  }
 0x7b9   :  { %1838 = dma.vmem_to_hbm [thread:$0]  %s1833_s24, 1024, %s3218_s6, [#allocation7], %s2140_s30, %s2140_s30, %s2141_s9  }
 0x7ba   :  { %s2107_s12 = scalar_lea.vmem %s1856_s26, 128  ;;  %p2112_p2 = scmp.lt.s32.totalorder %s1856_s26, %s1856_s26 }
 0x7bb   :  { %p2108_p1 = scmp.ne.s32.totalorder %s1856_s26, %s2107_s12  ;;  %p2113_p3 = scmp.lt.s32.totalorder %s2107_s12, %s2107_s12 }
 0x7bd   :  { %p2114_p4 = por %p2113_p3, %p2112_p2 }
 0x7bf   :  { %p2115_p5 = pnand %p2114_p4, %p2108_p1 }
 0x7c1   :  { %2118 = shalt.err (!%p2115_p5)
}
 0x7c2   :  { %1858 = dma.vmem_to_hbm [thread:$0]  %s1856_s26, 128, %s3220_s8, [#allocation10]  }
 0x7c3   :  { %2129 = dma.done.wait [#allocation7], 1024  }
 0x7c4   :  { %2130 = vsyncadd [#allocation7], 4294966272 }
 0x7c5   :  { %2131 = dma.done.wait [#allocation10], 256  }
 0x7c6   :  { %2132 = vsyncadd [#allocation10], 4294967040 }
 0x7c7   :  { %1868 = vsyncpa [#allocation6], 1 }
 0x7c8   :  { %1869 = vsyncpa [#allocation7], 1 }
 0x7c9   :  { %1870 = vsyncpa [#allocation10], 1 }

</bundles_post_ra>
